<compile_context>
chip_gen: v5e
topology: v5e:2x2
jax: 0.10.0
libtpu: 0.0.40
codegen_flags: <defaults>
</compile_context>

<pallas_src>
import functools

import jax
import jax.numpy as jnp
from jax.experimental import pallas as pl
from jax.experimental.pallas import tpu as pltpu


_PIPELINE_BUDGET_BYTES = 32 * 1024 * 1024   # double-buffered streamed blocks
_CONV_BLOCK_CAP_BYTES = 256 * 1024          # keep 9-tap acc chain near vregs


def _default_vmem_limit():
    """Per-generation scoped-VMEM request (review: bigger on v5e/v6e, keep
    headroom under v7x's 64 MiB)."""
    try:
        kind = jax.devices()[0].device_kind.lower()
    except Exception:
        return 48 * 1024 * 1024
    if ("v5" in kind and "lite" in kind) or "v5e" in kind or "v6" in kind:
        return 96 * 1024 * 1024     # 128 MiB physical VMEM
    return 48 * 1024 * 1024         # safe on v7x (64 MiB per TensorCore)


_VMEM_LIMIT_BYTES = _default_vmem_limit()


def _pick_hw_tile(hw, per_unit_bytes):
    """Largest multiple-of-128 divisor of `hw` whose double-buffered streamed
    footprint (`per_unit_bytes` per lane) fits the pipeline budget; falls back
    to the smallest such divisor, then to the full extent (always legal)."""
    cap = max(128, _PIPELINE_BUDGET_BYTES // max(per_unit_bytes, 1))
    best = smallest = None
    t = 128
    while t <= hw:
        if hw % t == 0:
            if smallest is None:
                smallest = t
            if t <= cap:
                best = t
        t += 128
    if best is not None:
        return best
    if smallest is not None:
        return smallest
    return hw


def _pick_channel_tile(ch, per_channel_bytes, cap_bytes):
    """Largest multiple-of-8 divisor of `ch` whose per-operand block fits
    `cap_bytes`; falls back to the smallest multiple-of-8 divisor, then to
    `ch` itself (a full-dim block is always a legal BlockSpec)."""
    best = smallest = None
    d = 8
    while d <= ch:
        if ch % d == 0:
            if smallest is None:
                smallest = d
            if d * per_channel_bytes <= cap_bytes:
                best = d
        d += 8
    if best is not None:
        return best
    if smallest is not None:
        return smallest
    return ch


# ----------------------------------------------------------------------------
# Pallas kernels
# ----------------------------------------------------------------------------
def _pre_norm_split_kernel(x_ref, w_ref, b_ref, o1_ref, o2_ref, *, eps, Ch):
    """channels_first LayerNorm on a lane-dense (1, C, t) block; writes the
    two channel halves as separate lane-dense outputs (feeds conv / FFT)."""
    x = x_ref[...].astype(jnp.float32)                 # (1, C, t)
    u = jnp.mean(x, axis=1, keepdims=True)             # mean over channels
    d = x - u
    s = jnp.mean(d * d, axis=1, keepdims=True)         # biased variance
    inv = jax.lax.rsqrt(s + eps)                       # EUP rsqrt (free slot)
    w = w_ref[...].astype(jnp.float32)                 # (1, C, 1)
    b = b_ref[...].astype(jnp.float32)
    y = w * (d * inv) + b
    o1_ref[...] = y[:, :Ch, :].astype(o1_ref.dtype)
    o2_ref[...] = y[:, Ch:, :].astype(o2_ref.dtype)


def _dwconv3x3_kernel(x_ref, w_ref, row_ref, col_ref, o_ref, *, H, W):
    """Depthwise 3x3 conv (padding=1, no bias) on a lane-dense (1, ct, H*W)
    block.  Halos via pltpu.roll on the flattened spatial axis + border masks
    (wrapped-around lanes always land on masked border positions)."""
    HW = H * W
    x = x_ref[...].astype(jnp.float32)                 # (1, ct, HW)
    w = w_ref[...].astype(jnp.float32)                 # (1, ct, 9)
    row = row_ref[...]                                 # (1, 1, HW) int32
    col = col_ref[...]                                 # (1, 1, HW) int32

    m_top = row >= 1           # valid when reading h-1
    m_bot = row <= H - 2       # valid when reading h+1
    m_left = col >= 1          # valid when reading w-1
    m_right = col <= W - 2     # valid when reading w+1

    acc = jnp.zeros(x.shape, jnp.float32)
    for dy in (-1, 0, 1):
        for dx in (-1, 0, 1):
            off = dy * W + dx                          # flattened neighbour offset
            tap = (dy + 1) * 3 + (dx + 1)              # PyTorch weight index ky*3+kx
            if off == 0:
                shifted = x
            else:
                shifted = pltpu.roll(x, shift=(-off) % HW, axis=2)
            mask = None
            if dy == -1:
                mask = m_top
            elif dy == 1:
                mask = m_bot
            if dx == -1:
                mask = m_left if mask is None else jnp.logical_and(mask, m_left)
            elif dx == 1:
                mask = m_right if mask is None else jnp.logical_and(mask, m_right)
            if mask is not None:
                shifted = jnp.where(mask, shifted, 0.0)
            acc = acc + shifted * w[:, :, tap:tap + 1]
    o_ref[...] = acc.astype(o_ref.dtype)


def _post_norm_interleave_kernel(x1_ref, x2_ref, w_ref, b_ref, o_ref, *, eps):
    """Fused channel-interleave + channels_first LayerNorm on a spatial tile.

    Output block is (1, Ch, 2, t): out[:, c, 0] is final channel 2c (local
    branch), out[:, c, 1] is final channel 2c+1 (global branch), so the
    wrapper reshape to (B, C, H, W) is free and equals
    torch.cat([x1.unsqueeze(2), x2.unsqueeze(2)], 2).reshape(...).
    """
    x1 = x1_ref[...].astype(jnp.float32)               # (1, Ch, t)
    x2 = x2_ref[...].astype(jnp.float32)               # (1, Ch, t)
    Ch = x1.shape[1]
    inv_c = 1.0 / (2 * Ch)
    u = (jnp.sum(x1, axis=1, keepdims=True)
         + jnp.sum(x2, axis=1, keepdims=True)) * inv_c
    d1 = x1 - u
    d2 = x2 - u
    var = (jnp.sum(d1 * d1, axis=1, keepdims=True)
           + jnp.sum(d2 * d2, axis=1, keepdims=True)) * inv_c
    inv = jax.lax.rsqrt(var + eps)
    w = w_ref[...].astype(jnp.float32)                 # (1, Ch, 2)
    b = b_ref[...].astype(jnp.float32)
    y0 = (w[:, :, 0:1] * (d1 * inv) + b[:, :, 0:1]).astype(o_ref.dtype)
    y1 = (w[:, :, 1:2] * (d2 * inv) + b[:, :, 1:2]).astype(o_ref.dtype)
    o_ref[:, :, 0:1, :] = y0[:, :, None, :]
    o_ref[:, :, 1:2, :] = y1[:, :, None, :]


# ----------------------------------------------------------------------------
# Pallas call wrappers
# ----------------------------------------------------------------------------
def pre_norm_split(x_flat, weight, bias, Ch, eps=1e-6):
    """x_flat: (B, C, H*W).  Returns the two normalized channel halves as
    lane-dense (B, Ch, H*W) arrays."""
    B, C, HW = x_flat.shape
    per_unit = 2 * (C + 2 * Ch) * 4          # double-buffered bytes per lane
    t = _pick_hw_tile(HW, per_unit)
    w3 = weight.reshape(1, C, 1).astype(jnp.float32)
    b3 = bias.reshape(1, C, 1).astype(jnp.float32)
    half = jax.ShapeDtypeStruct((B, Ch, HW), x_flat.dtype)
    return pl.pallas_call(
        functools.partial(_pre_norm_split_kernel, eps=eps, Ch=Ch),
        out_shape=(half, half),
        grid=(B, HW // t),
        in_specs=[
            pl.BlockSpec((1, C, t), lambda b, s: (b, 0, s)),
            pl.BlockSpec((1, C, 1), lambda b, s: (0, 0, 0)),
            pl.BlockSpec((1, C, 1), lambda b, s: (0, 0, 0)),
        ],
        out_specs=(
            pl.BlockSpec((1, Ch, t), lambda b, s: (b, 0, s)),
            pl.BlockSpec((1, Ch, t), lambda b, s: (b, 0, s)),
        ),
        compiler_params=pltpu.CompilerParams(
            dimension_semantics=("parallel", "parallel"),
            vmem_limit_bytes=_VMEM_LIMIT_BYTES),
        cost_estimate=pl.CostEstimate(
            flops=8 * B * C * HW, transcendentals=B * HW,
            bytes_accessed=8 * B * C * HW),
    )(x_flat, w3, b3)


def depthwise_conv3x3(x1_flat, dw_weight, H, W):
    """x1_flat: (B, Ch, H*W) pre-norm local half -> depthwise conv, same shape."""
    B, Ch, HW = x1_flat.shape
    ct = _pick_channel_tile(Ch, HW * 4, _CONV_BLOCK_CAP_BYTES)
    w9 = dw_weight.reshape(1, Ch, 9).astype(jnp.float32)
    rows = (jnp.arange(HW, dtype=jnp.int32) // W).reshape(1, 1, HW)
    cols = (jnp.arange(HW, dtype=jnp.int32) % W).reshape(1, 1, HW)
    return pl.pallas_call(
        functools.partial(_dwconv3x3_kernel, H=H, W=W),
        out_shape=jax.ShapeDtypeStruct((B, Ch, HW), x1_flat.dtype),
        grid=(B, Ch // ct),
        in_specs=[
            pl.BlockSpec((1, ct, HW), lambda b, c: (b, c, 0)),
            pl.BlockSpec((1, ct, 9), lambda b, c: (0, c, 0)),
            pl.BlockSpec((1, 1, HW), lambda b, c: (0, 0, 0)),
            pl.BlockSpec((1, 1, HW), lambda b, c: (0, 0, 0)),
        ],
        out_specs=pl.BlockSpec((1, ct, HW), lambda b, c: (b, c, 0)),
        compiler_params=pltpu.CompilerParams(
            dimension_semantics=("parallel", "parallel"),
            vmem_limit_bytes=_VMEM_LIMIT_BYTES),
        cost_estimate=pl.CostEstimate(
            flops=18 * B * Ch * HW, transcendentals=0,
            bytes_accessed=8 * B * Ch * HW),
    )(x1_flat, w9, rows, cols)


def post_norm_interleave(x1_flat, x2_flat, weight, bias, eps=1e-6):
    """Fused interleave + post LayerNorm, spatially tiled.  Returns
    (B, Ch, 2, HW); row-major reshape to (B, 2*Ch, H, W) is the interleave."""
    B, Ch, HW = x1_flat.shape
    # out block (1, Ch, 2, t) pads the size-2 sublane dim to 8 in VMEM -> 8x.
    per_unit = 2 * (Ch + Ch + 8 * Ch) * 4
    t = _pick_hw_tile(HW, per_unit)
    w3 = weight.reshape(1, Ch, 2).astype(jnp.float32)   # [c, k] = weight[2c+k]
    b3 = bias.reshape(1, Ch, 2).astype(jnp.float32)
    return pl.pallas_call(
        functools.partial(_post_norm_interleave_kernel, eps=eps),
        out_shape=jax.ShapeDtypeStruct((B, Ch, 2, HW), x1_flat.dtype),
        grid=(B, HW // t),
        in_specs=[
            pl.BlockSpec((1, Ch, t), lambda b, s: (b, 0, s)),
            pl.BlockSpec((1, Ch, t), lambda b, s: (b, 0, s)),
            pl.BlockSpec((1, Ch, 2), lambda b, s: (0, 0, 0)),
            pl.BlockSpec((1, Ch, 2), lambda b, s: (0, 0, 0)),
        ],
        out_specs=pl.BlockSpec((1, Ch, 2, t), lambda b, s: (b, 0, 0, s)),
        compiler_params=pltpu.CompilerParams(
            dimension_semantics=("parallel", "parallel"),
            vmem_limit_bytes=_VMEM_LIMIT_BYTES),
        cost_estimate=pl.CostEstimate(
            flops=16 * B * Ch * HW, transcendentals=B * HW,
            bytes_accessed=16 * B * Ch * HW),
    )(x1_flat, x2_flat, w3, b3)


# ----------------------------------------------------------------------------
# Plain-JAX glue
# ----------------------------------------------------------------------------
def _bilinear_align_corners(w, out_h, out_w):
    """Bilinear resize (C, Hi, Wi, 2) -> (C, out_h, out_w, 2), align_corners=True."""
    C, Hi, Wi, _ = w.shape
    if (Hi, Wi) == (out_h, out_w):
        return w
    ys = jnp.linspace(0.0, Hi - 1.0, out_h)
    xs = jnp.linspace(0.0, Wi - 1.0, out_w)
    y0 = jnp.floor(ys).astype(jnp.int32)
    x0 = jnp.floor(xs).astype(jnp.int32)
    y1 = jnp.minimum(y0 + 1, Hi - 1)
    x1 = jnp.minimum(x0 + 1, Wi - 1)
    fy = (ys - y0)[None, :, None, None]
    fx = (xs - x0)[None, None, :, None]

    def gather(yi, xi):
        return w[:, yi][:, :, xi]                       # (C, out_h, out_w, 2)

    v00, v01 = gather(y0, x0), gather(y0, x1)
    v10, v11 = gather(y1, x0), gather(y1, x1)
    return (v00 * (1 - fy) * (1 - fx) + v01 * (1 - fy) * fx
            + v10 * fy * (1 - fx) + v11 * fy * fx)


def global_local_conv2_norm(x, params, eps=1e-6):
    """Forward pass of GlobalLocalConv2Norm.  x: (B, dim, H, W) float32, NCHW."""
    B, C, H, W = x.shape
    assert C % 2 == 0, "GlobalLocalConv2Norm requires an even channel count"
    Ch = C // 2
    HW = H * W

    # pre_norm (channels_first LN) + channel split -- Pallas kernel
    xn1, xn2 = pre_norm_split(x.reshape(B, C, HW), params["pre_w"],
                              params["pre_b"], Ch, eps)

    # local branch: depthwise 3x3 conv on lane-dense blocks -- Pallas kernel
    x1 = depthwise_conv3x3(xn1, params["dw_w"], H, W)        # (B, Ch, HW)

    # global branch: spectral filter.
    # TODO(synk): rfft2/irfft2 have no Pallas TPU primitive; they stay in
    # jnp.fft, and (per the perf review) the elementwise complex multiply is
    # left to XLA so it fuses with the FFT custom calls instead of paying a
    # Pallas boundary (real/imag split + recombine = 4 extra HBM tensors).
    x2 = xn2.reshape(B, Ch, H, W).astype(jnp.float32)
    x2f = jnp.fft.rfft2(x2, axes=(2, 3), norm="ortho")       # (B, Ch, H, Wr)
    Wr = W // 2 + 1
    cw = _bilinear_align_corners(params["complex_weight"].astype(jnp.float32),
                                 H, Wr)                       # (Ch, H, Wr, 2)
    wc = jax.lax.complex(cw[..., 0], cw[..., 1])[None]        # (1, Ch, H, Wr)
    x2o = jnp.fft.irfft2(x2f * wc, s=(H, W), axes=(2, 3),
                         norm="ortho").astype(x.dtype)        # (B, Ch, H, W)

    # fused interleave + post_norm (channels_first LN) -- Pallas kernel
    out = post_norm_interleave(x1, x2o.reshape(B, Ch, HW),
                               params["post_w"], params["post_b"], eps)
    # (B, Ch, 2, HW) row-major == interleaved (B, C, H, W): free reshape.
    return out.reshape(B, C, H, W)


def _reference_forward(x, params, eps=1e-6):
    """Pure-JAX reference mirroring the PyTorch module (for the self-check)."""
    B, C, H, W = x.shape
    Ch = C // 2

    def ln_cf(v, w, b):
        u = v.mean(axis=1, keepdims=True)
        s = ((v - u) ** 2).mean(axis=1, keepdims=True)
        vhat = (v - u) / jnp.sqrt(s + eps)
        return w[None, :, None, None] * vhat + b[None, :, None, None]

    xn = ln_cf(x, params["pre_w"], params["pre_b"])
    x1, x2 = xn[:, :Ch], xn[:, Ch:]
    wdw = params["dw_w"][:, None, :, :]                       # (Ch, 1, 3, 3)
    x1 = jax.lax.conv_general_dilated(
        x1, wdw, window_strides=(1, 1), padding=((1, 1), (1, 1)),
        dimension_numbers=("NCHW", "OIHW", "NCHW"), feature_group_count=Ch)
    x2 = x2.astype(jnp.float32)
    x2f = jnp.fft.rfft2(x2, axes=(2, 3), norm="ortho")
    Wr = W // 2 + 1
    cw = _bilinear_align_corners(params["complex_weight"].astype(jnp.float32), H, Wr)
    wc = jax.lax.complex(cw[..., 0], cw[..., 1])[None]
    x2o = jnp.fft.irfft2(x2f * wc, s=(H, W), axes=(2, 3), norm="ortho")
    xi = jnp.stack([x1, x2o.astype(x.dtype)], axis=2).reshape(B, C, H, W)
    return ln_cf(xi, params["post_w"], params["post_b"])


def init_params(key, dim, h=14, w=8):
    Ch = dim // 2
    k1, k2 = jax.random.split(key)
    # nn.Conv2d default init ~ U(-1/sqrt(fan_in), 1/sqrt(fan_in)), fan_in = 9
    dw_w = jax.random.uniform(k1, (Ch, 3, 3), jnp.float32, -1.0 / 3.0, 1.0 / 3.0)
    # complex_weight: trunc_normal_(std=0.02) approximated with normal * 0.02
    complex_weight = jax.random.normal(k2, (Ch, h, w, 2), jnp.float32) * 0.02
    return dict(
        pre_w=jnp.ones((dim,), jnp.float32),
        pre_b=jnp.zeros((dim,), jnp.float32),
        post_w=jnp.ones((dim,), jnp.float32),
        post_b=jnp.zeros((dim,), jnp.float32),
        dw_w=dw_w,
        complex_weight=complex_weight,
    )


if __name__ == "__main__":
    B, dim, H, W = 2, 4, 16, 16
    key = jax.random.PRNGKey(0)
    kx, kp = jax.random.split(key)
    x = jax.random.normal(kx, (B, dim, H, W), jnp.float32)
    params = init_params(kp, dim, h=14, w=8)

    out = jax.block_until_ready(jax.jit(global_local_conv2_norm)(x, params))
    assert out.shape == (B, dim, H, W) and out.dtype == jnp.float32

    ref = jax.block_until_ready(jax.jit(_reference_forward)(x, params))
    err = float(jnp.max(jnp.abs(out - ref)))
    assert err < 1e-3, f"max abs error vs reference: {err}"
    print("KERNEL_OK")
</pallas_src>

<mosaic_0001>
module attributes {stable_mosaic.version = 11 : i64} {
  func.func @_pre_norm_split_kernel(%arg0: i32, %arg1: i32, %arg2: memref<1x4x256xf32, #tpu.memory_space<vmem>>, %arg3: memref<1x4x1xf32, #tpu.memory_space<vmem>>, %arg4: memref<1x4x1xf32, #tpu.memory_space<vmem>>, %arg5: memref<1x2x256xf32, #tpu.memory_space<vmem>>, %arg6: memref<1x2x256xf32, #tpu.memory_space<vmem>>) attributes {dimension_semantics = [#tpu.dimension_semantics<parallel>, #tpu.dimension_semantics<parallel>], iteration_bounds = array<i64: 2, 1>, scalar_prefetch = 0 : i64, scratch_operands = 0 : i64, tpu.core_type = #tpu.core_type<tc>, window_params = [{transform_indices = @transform_0, window_bounds = array<i64: 1, 4, 256>}, {pipeline_mode = #tpu.pipeline_mode<synchronous>, transform_indices = @transform_1, window_bounds = array<i64: 1, 4, 1>}, {pipeline_mode = #tpu.pipeline_mode<synchronous>, transform_indices = @transform_2, window_bounds = array<i64: 1, 4, 1>}, {transform_indices = @transform_3, window_bounds = array<i64: 1, 2, 256>}, {transform_indices = @transform_4, window_bounds = array<i64: 1, 2, 256>}]} {
    %c0 = arith.constant 0 : index
    %c0_0 = arith.constant 0 : index
    %c0_1 = arith.constant 0 : index
    %0 = vector.load %arg2[%c0, %c0_0, %c0_1] : memref<1x4x256xf32, #tpu.memory_space<vmem>>, vector<1x4x256xf32>
    %cst = arith.constant dense<0.000000e+00> : vector<1x256xf32>
    %1 = vector.multi_reduction <add>, %0, %cst [1] : vector<1x4x256xf32> to vector<1x256xf32>
    %2 = vector.shape_cast %1 : vector<1x256xf32> to vector<1x1x256xf32>
    %cst_2 = arith.constant 4.000000e+00 : f32
    %3 = vector.broadcast %cst_2 : f32 to vector<1x1x256xf32>
    %4 = arith.divf %2, %3 : vector<1x1x256xf32>
    %5 = vector.broadcast %4 : vector<1x1x256xf32> to vector<1x4x256xf32>
    %6 = arith.subf %0, %5 : vector<1x4x256xf32>
    %7 = arith.mulf %6, %6 : vector<1x4x256xf32>
    %cst_3 = arith.constant dense<0.000000e+00> : vector<1x256xf32>
    %8 = vector.multi_reduction <add>, %7, %cst_3 [1] : vector<1x4x256xf32> to vector<1x256xf32>
    %9 = vector.shape_cast %8 : vector<1x256xf32> to vector<1x1x256xf32>
    %cst_4 = arith.constant 4.000000e+00 : f32
    %10 = vector.broadcast %cst_4 : f32 to vector<1x1x256xf32>
    %11 = arith.divf %9, %10 : vector<1x1x256xf32>
    %cst_5 = arith.constant 9.99999997E-7 : f32
    %12 = vector.broadcast %cst_5 : f32 to vector<1x1x256xf32>
    %13 = arith.addf %11, %12 : vector<1x1x256xf32>
    %14 = math.rsqrt %13 : vector<1x1x256xf32>
    %c0_6 = arith.constant 0 : index
    %c0_7 = arith.constant 0 : index
    %c0_8 = arith.constant 0 : index
    %15 = vector.load %arg3[%c0_6, %c0_7, %c0_8] : memref<1x4x1xf32, #tpu.memory_space<vmem>>, vector<1x4x1xf32>
    %c0_9 = arith.constant 0 : index
    %c0_10 = arith.constant 0 : index
    %c0_11 = arith.constant 0 : index
    %16 = vector.load %arg4[%c0_9, %c0_10, %c0_11] : memref<1x4x1xf32, #tpu.memory_space<vmem>>, vector<1x4x1xf32>
    %17 = vector.broadcast %14 : vector<1x1x256xf32> to vector<1x4x256xf32>
    %18 = arith.mulf %6, %17 : vector<1x4x256xf32>
    %19 = vector.broadcast %15 : vector<1x4x1xf32> to vector<1x4x256xf32>
    %20 = arith.mulf %19, %18 : vector<1x4x256xf32>
    %21 = vector.broadcast %16 : vector<1x4x1xf32> to vector<1x4x256xf32>
    %22 = arith.addf %20, %21 : vector<1x4x256xf32>
    %23 = vector.extract_strided_slice %22 {offsets = [0, 0, 0], sizes = [1, 2, 256], strides = [1, 1, 1]} : vector<1x4x256xf32> to vector<1x2x256xf32>
    %c0_12 = arith.constant 0 : index
    %c0_13 = arith.constant 0 : index
    %c0_14 = arith.constant 0 : index
    %24 = vector.load %arg5[%c0_12, %c0_13, %c0_14] : memref<1x2x256xf32, #tpu.memory_space<vmem>>, vector<1x2x256xf32>
    tpu.vector_store %arg5[%c0_12, %c0_13, %c0_14], %23 {strides = array<i32>} : memref<1x2x256xf32, #tpu.memory_space<vmem>>, vector<1x2x256xf32>,
    %25 = vector.extract_strided_slice %22 {offsets = [0, 2, 0], sizes = [1, 2, 256], strides = [1, 1, 1]} : vector<1x4x256xf32> to vector<1x2x256xf32>
    %c0_15 = arith.constant 0 : index
    %c0_16 = arith.constant 0 : index
    %c0_17 = arith.constant 0 : index
    %26 = vector.load %arg6[%c0_15, %c0_16, %c0_17] : memref<1x2x256xf32, #tpu.memory_space<vmem>>, vector<1x2x256xf32>
    tpu.vector_store %arg6[%c0_15, %c0_16, %c0_17], %25 {strides = array<i32>} : memref<1x2x256xf32, #tpu.memory_space<vmem>>, vector<1x2x256xf32>,
    return
  }
  func.func @transform_0(%arg0: i32, %arg1: i32) -> (i32, i32, i32) {
    %c0_i32 = arith.constant 0 : i32
    %c0_i32_0 = arith.constant 0 : i32
    return %arg0, %c0_i32, %arg1 : i32, i32, i32
  }
  func.func @transform_1(%arg0: i32, %arg1: i32) -> (i32, i32, i32) {
    %c0_i32 = arith.constant 0 : i32
    %c0_i32_0 = arith.constant 0 : i32
    %c0_i32_1 = arith.constant 0 : i32
    %c0_i32_2 = arith.constant 0 : i32
    return %c0_i32, %c0_i32_0, %c0_i32_1 : i32, i32, i32
  }
  func.func @transform_2(%arg0: i32, %arg1: i32) -> (i32, i32, i32) {
    %c0_i32 = arith.constant 0 : i32
    %c0_i32_0 = arith.constant 0 : i32
    %c0_i32_1 = arith.constant 0 : i32
    %c0_i32_2 = arith.constant 0 : i32
    return %c0_i32, %c0_i32_0, %c0_i32_1 : i32, i32, i32
  }
  func.func @transform_3(%arg0: i32, %arg1: i32) -> (i32, i32, i32) {
    %c0_i32 = arith.constant 0 : i32
    %c0_i32_0 = arith.constant 0 : i32
    return %arg0, %c0_i32, %arg1 : i32, i32, i32
  }
  func.func @transform_4(%arg0: i32, %arg1: i32) -> (i32, i32, i32) {
    %c0_i32 = arith.constant 0 : i32
    %c0_i32_0 = arith.constant 0 : i32
    return %arg0, %c0_i32, %arg1 : i32, i32, i32
  }
}

module attributes {stable_mosaic.version = 11 : i64} {
  func.func @_dwconv3x3_kernel(%arg0: i32, %arg1: i32, %arg2: memref<1x2x256xf32, #tpu.memory_space<vmem>>, %arg3: memref<1x2x9xf32, #tpu.memory_space<vmem>>, %arg4: memref<1x1x256xi32, #tpu.memory_space<vmem>>, %arg5: memref<1x1x256xi32, #tpu.memory_space<vmem>>, %arg6: memref<1x2x256xf32, #tpu.memory_space<vmem>>) attributes {dimension_semantics = [#tpu.dimension_semantics<parallel>, #tpu.dimension_semantics<parallel>], iteration_bounds = array<i64: 2, 1>, scalar_prefetch = 0 : i64, scratch_operands = 0 : i64, tpu.core_type = #tpu.core_type<tc>, window_params = [{transform_indices = @transform_0, window_bounds = array<i64: 1, 2, 256>}, {transform_indices = @transform_1, window_bounds = array<i64: 1, 2, 9>}, {pipeline_mode = #tpu.pipeline_mode<synchronous>, transform_indices = @transform_2, window_bounds = array<i64: 1, 1, 256>}, {pipeline_mode = #tpu.pipeline_mode<synchronous>, transform_indices = @transform_3, window_bounds = array<i64: 1, 1, 256>}, {transform_indices = @transform_4, window_bounds = array<i64: 1, 2, 256>}]} {
    %c0 = arith.constant 0 : index
    %c0_0 = arith.constant 0 : index
    %c0_1 = arith.constant 0 : index
    %0 = vector.load %arg2[%c0, %c0_0, %c0_1] : memref<1x2x256xf32, #tpu.memory_space<vmem>>, vector<1x2x256xf32>
    %c0_2 = arith.constant 0 : index
    %c0_3 = arith.constant 0 : index
    %c0_4 = arith.constant 0 : index
    %1 = vector.load %arg3[%c0_2, %c0_3, %c0_4] : memref<1x2x9xf32, #tpu.memory_space<vmem>>, vector<1x2x9xf32>
    %c0_5 = arith.constant 0 : index
    %c0_6 = arith.constant 0 : index
    %c0_7 = arith.constant 0 : index
    %2 = vector.load %arg4[%c0_5, %c0_6, %c0_7] : memref<1x1x256xi32, #tpu.memory_space<vmem>>, vector<1x1x256xi32>
    %c0_8 = arith.constant 0 : index
    %c0_9 = arith.constant 0 : index
    %c0_10 = arith.constant 0 : index
    %3 = vector.load %arg5[%c0_8, %c0_9, %c0_10] : memref<1x1x256xi32, #tpu.memory_space<vmem>>, vector<1x1x256xi32>
    %c1_i32 = arith.constant 1 : i32
    %4 = vector.broadcast %c1_i32 : i32 to vector<1x1x256xi32>
    %5 = arith.cmpi sge, %2, %4 : vector<1x1x256xi32>
    %c14_i32 = arith.constant 14 : i32
    %6 = vector.broadcast %c14_i32 : i32 to vector<1x1x256xi32>
    %7 = arith.cmpi sle, %2, %6 : vector<1x1x256xi32>
    %c1_i32_11 = arith.constant 1 : i32
    %8 = vector.broadcast %c1_i32_11 : i32 to vector<1x1x256xi32>
    %9 = arith.cmpi sge, %3, %8 : vector<1x1x256xi32>
    %c14_i32_12 = arith.constant 14 : i32
    %10 = vector.broadcast %c14_i32_12 : i32 to vector<1x1x256xi32>
    %11 = arith.cmpi sle, %3, %10 : vector<1x1x256xi32>
    %cst = arith.constant 0.000000e+00 : f32
    %12 = vector.broadcast %cst : f32 to vector<1x2x256xf32>
    %c17_i32 = arith.constant 17 : i32
    %13 = tpu.dynamic_rotate %0 by %c17_i32 dim 2 : vector<1x2x256xf32>, i32 -> vector<1x2x256xf32>
    %14 = arith.andi %5, %9 : vector<1x1x256xi1>
    %cst_13 = arith.constant 0.000000e+00 : f32
    %15 = vector.shape_cast %14 : vector<1x1x256xi1> to vector<1x1x256xi1>
    %16 = vector.broadcast %15 : vector<1x1x256xi1> to vector<1x2x256xi1>
    %17 = vector.broadcast %cst_13 : f32 to vector<1x2x256xf32>
    %18 = arith.select %16, %13, %17 : vector<1x2x256xi1>, vector<1x2x256xf32>
    %19 = vector.extract_strided_slice %1 {offsets = [0, 0, 0], sizes = [1, 2, 1], strides = [1, 1, 1]} : vector<1x2x9xf32> to vector<1x2x1xf32>
    %20 = vector.broadcast %19 : vector<1x2x1xf32> to vector<1x2x256xf32>
    %21 = arith.mulf %18, %20 : vector<1x2x256xf32>
    %22 = arith.addf %12, %21 : vector<1x2x256xf32>
    %c16_i32 = arith.constant 16 : i32
    %23 = tpu.dynamic_rotate %0 by %c16_i32 dim 2 : vector<1x2x256xf32>, i32 -> vector<1x2x256xf32>
    %cst_14 = arith.constant 0.000000e+00 : f32
    %24 = vector.shape_cast %5 : vector<1x1x256xi1> to vector<1x1x256xi1>
    %25 = vector.broadcast %24 : vector<1x1x256xi1> to vector<1x2x256xi1>
    %26 = vector.broadcast %cst_14 : f32 to vector<1x2x256xf32>
    %27 = arith.select %25, %23, %26 : vector<1x2x256xi1>, vector<1x2x256xf32>
    %28 = vector.extract_strided_slice %1 {offsets = [0, 0, 1], sizes = [1, 2, 1], strides = [1, 1, 1]} : vector<1x2x9xf32> to vector<1x2x1xf32>
    %29 = vector.broadcast %28 : vector<1x2x1xf32> to vector<1x2x256xf32>
    %30 = arith.mulf %27, %29 : vector<1x2x256xf32>
    %31 = arith.addf %22, %30 : vector<1x2x256xf32>
    %c15_i32 = arith.constant 15 : i32
    %32 = tpu.dynamic_rotate %0 by %c15_i32 dim 2 : vector<1x2x256xf32>, i32 -> vector<1x2x256xf32>
    %33 = arith.andi %5, %11 : vector<1x1x256xi1>
    %cst_15 = arith.constant 0.000000e+00 : f32
    %34 = vector.shape_cast %33 : vector<1x1x256xi1> to vector<1x1x256xi1>
    %35 = vector.broadcast %34 : vector<1x1x256xi1> to vector<1x2x256xi1>
    %36 = vector.broadcast %cst_15 : f32 to vector<1x2x256xf32>
    %37 = arith.select %35, %32, %36 : vector<1x2x256xi1>, vector<1x2x256xf32>
    %38 = vector.extract_strided_slice %1 {offsets = [0, 0, 2], sizes = [1, 2, 1], strides = [1, 1, 1]} : vector<1x2x9xf32> to vector<1x2x1xf32>
    %39 = vector.broadcast %38 : vector<1x2x1xf32> to vector<1x2x256xf32>
    %40 = arith.mulf %37, %39 : vector<1x2x256xf32>
    %41 = arith.addf %31, %40 : vector<1x2x256xf32>
    %c1_i32_16 = arith.constant 1 : i32
    %42 = tpu.dynamic_rotate %0 by %c1_i32_16 dim 2 : vector<1x2x256xf32>, i32 -> vector<1x2x256xf32>
    %cst_17 = arith.constant 0.000000e+00 : f32
    %43 = vector.shape_cast %9 : vector<1x1x256xi1> to vector<1x1x256xi1>
    %44 = vector.broadcast %43 : vector<1x1x256xi1> to vector<1x2x256xi1>
    %45 = vector.broadcast %cst_17 : f32 to vector<1x2x256xf32>
    %46 = arith.select %44, %42, %45 : vector<1x2x256xi1>, vector<1x2x256xf32>
    %47 = vector.extract_strided_slice %1 {offsets = [0, 0, 3], sizes = [1, 2, 1], strides = [1, 1, 1]} : vector<1x2x9xf32> to vector<1x2x1xf32>
    %48 = vector.broadcast %47 : vector<1x2x1xf32> to vector<1x2x256xf32>
    %49 = arith.mulf %46, %48 : vector<1x2x256xf32>
    %50 = arith.addf %41, %49 : vector<1x2x256xf32>
    %51 = vector.extract_strided_slice %1 {offsets = [0, 0, 4], sizes = [1, 2, 1], strides = [1, 1, 1]} : vector<1x2x9xf32> to vector<1x2x1xf32>
    %52 = vector.broadcast %51 : vector<1x2x1xf32> to vector<1x2x256xf32>
    %53 = arith.mulf %0, %52 : vector<1x2x256xf32>
    %54 = arith.addf %50, %53 : vector<1x2x256xf32>
    %c255_i32 = arith.constant 255 : i32
    %55 = tpu.dynamic_rotate %0 by %c255_i32 dim 2 : vector<1x2x256xf32>, i32 -> vector<1x2x256xf32>
    %cst_18 = arith.constant 0.000000e+00 : f32
    %56 = vector.shape_cast %11 : vector<1x1x256xi1> to vector<1x1x256xi1>
    %57 = vector.broadcast %56 : vector<1x1x256xi1> to vector<1x2x256xi1>
    %58 = vector.broadcast %cst_18 : f32 to vector<1x2x256xf32>
    %59 = arith.select %57, %55, %58 : vector<1x2x256xi1>, vector<1x2x256xf32>
    %60 = vector.extract_strided_slice %1 {offsets = [0, 0, 5], sizes = [1, 2, 1], strides = [1, 1, 1]} : vector<1x2x9xf32> to vector<1x2x1xf32>
    %61 = vector.broadcast %60 : vector<1x2x1xf32> to vector<1x2x256xf32>
    %62 = arith.mulf %59, %61 : vector<1x2x256xf32>
    %63 = arith.addf %54, %62 : vector<1x2x256xf32>
    %c241_i32 = arith.constant 241 : i32
    %64 = tpu.dynamic_rotate %0 by %c241_i32 dim 2 : vector<1x2x256xf32>, i32 -> vector<1x2x256xf32>
    %65 = arith.andi %7, %9 : vector<1x1x256xi1>
    %cst_19 = arith.constant 0.000000e+00 : f32
    %66 = vector.shape_cast %65 : vector<1x1x256xi1> to vector<1x1x256xi1>
    %67 = vector.broadcast %66 : vector<1x1x256xi1> to vector<1x2x256xi1>
    %68 = vector.broadcast %cst_19 : f32 to vector<1x2x256xf32>
    %69 = arith.select %67, %64, %68 : vector<1x2x256xi1>, vector<1x2x256xf32>
    %70 = vector.extract_strided_slice %1 {offsets = [0, 0, 6], sizes = [1, 2, 1], strides = [1, 1, 1]} : vector<1x2x9xf32> to vector<1x2x1xf32>
    %71 = vector.broadcast %70 : vector<1x2x1xf32> to vector<1x2x256xf32>
    %72 = arith.mulf %69, %71 : vector<1x2x256xf32>
    %73 = arith.addf %63, %72 : vector<1x2x256xf32>
    %c240_i32 = arith.constant 240 : i32
    %74 = tpu.dynamic_rotate %0 by %c240_i32 dim 2 : vector<1x2x256xf32>, i32 -> vector<1x2x256xf32>
    %cst_20 = arith.constant 0.000000e+00 : f32
    %75 = vector.shape_cast %7 : vector<1x1x256xi1> to vector<1x1x256xi1>
    %76 = vector.broadcast %75 : vector<1x1x256xi1> to vector<1x2x256xi1>
    %77 = vector.broadcast %cst_20 : f32 to vector<1x2x256xf32>
    %78 = arith.select %76, %74, %77 : vector<1x2x256xi1>, vector<1x2x256xf32>
    %79 = vector.extract_strided_slice %1 {offsets = [0, 0, 7], sizes = [1, 2, 1], strides = [1, 1, 1]} : vector<1x2x9xf32> to vector<1x2x1xf32>
    %80 = vector.broadcast %79 : vector<1x2x1xf32> to vector<1x2x256xf32>
    %81 = arith.mulf %78, %80 : vector<1x2x256xf32>
    %82 = arith.addf %73, %81 : vector<1x2x256xf32>
    %c239_i32 = arith.constant 239 : i32
    %83 = tpu.dynamic_rotate %0 by %c239_i32 dim 2 : vector<1x2x256xf32>, i32 -> vector<1x2x256xf32>
    %84 = arith.andi %7, %11 : vector<1x1x256xi1>
    %cst_21 = arith.constant 0.000000e+00 : f32
    %85 = vector.shape_cast %84 : vector<1x1x256xi1> to vector<1x1x256xi1>
    %86 = vector.broadcast %85 : vector<1x1x256xi1> to vector<1x2x256xi1>
    %87 = vector.broadcast %cst_21 : f32 to vector<1x2x256xf32>
    %88 = arith.select %86, %83, %87 : vector<1x2x256xi1>, vector<1x2x256xf32>
    %89 = vector.extract_strided_slice %1 {offsets = [0, 0, 8], sizes = [1, 2, 1], strides = [1, 1, 1]} : vector<1x2x9xf32> to vector<1x2x1xf32>
    %90 = vector.broadcast %89 : vector<1x2x1xf32> to vector<1x2x256xf32>
    %91 = arith.mulf %88, %90 : vector<1x2x256xf32>
    %92 = arith.addf %82, %91 : vector<1x2x256xf32>
    %c0_22 = arith.constant 0 : index
    %c0_23 = arith.constant 0 : index
    %c0_24 = arith.constant 0 : index
    %93 = vector.load %arg6[%c0_22, %c0_23, %c0_24] : memref<1x2x256xf32, #tpu.memory_space<vmem>>, vector<1x2x256xf32>
    tpu.vector_store %arg6[%c0_22, %c0_23, %c0_24], %92 {strides = array<i32>} : memref<1x2x256xf32, #tpu.memory_space<vmem>>, vector<1x2x256xf32>,
    return
  }
  func.func @transform_0(%arg0: i32, %arg1: i32) -> (i32, i32, i32) {
    %c0_i32 = arith.constant 0 : i32
    %c0_i32_0 = arith.constant 0 : i32
    return %arg0, %arg1, %c0_i32 : i32, i32, i32
  }
  func.func @transform_1(%arg0: i32, %arg1: i32) -> (i32, i32, i32) {
    %c0_i32 = arith.constant 0 : i32
    %c0_i32_0 = arith.constant 0 : i32
    %c0_i32_1 = arith.constant 0 : i32
    return %c0_i32, %arg1, %c0_i32_0 : i32, i32, i32
  }
  func.func @transform_2(%arg0: i32, %arg1: i32) -> (i32, i32, i32) {
    %c0_i32 = arith.constant 0 : i32
    %c0_i32_0 = arith.constant 0 : i32
    %c0_i32_1 = arith.constant 0 : i32
    %c0_i32_2 = arith.constant 0 : i32
    return %c0_i32, %c0_i32_0, %c0_i32_1 : i32, i32, i32
  }
  func.func @transform_3(%arg0: i32, %arg1: i32) -> (i32, i32, i32) {
    %c0_i32 = arith.constant 0 : i32
    %c0_i32_0 = arith.constant 0 : i32
    %c0_i32_1 = arith.constant 0 : i32
    %c0_i32_2 = arith.constant 0 : i32
    return %c0_i32, %c0_i32_0, %c0_i32_1 : i32, i32, i32
  }
  func.func @transform_4(%arg0: i32, %arg1: i32) -> (i32, i32, i32) {
    %c0_i32 = arith.constant 0 : i32
    %c0_i32_0 = arith.constant 0 : i32
    return %arg0, %arg1, %c0_i32 : i32, i32, i32
  }
}

module attributes {stable_mosaic.version = 11 : i64} {
  func.func @_post_norm_interleave_kernel(%arg0: i32, %arg1: i32, %arg2: memref<1x2x256xf32, #tpu.memory_space<vmem>>, %arg3: memref<1x2x256xf32, #tpu.memory_space<vmem>>, %arg4: memref<1x2x2xf32, #tpu.memory_space<vmem>>, %arg5: memref<1x2x2xf32, #tpu.memory_space<vmem>>, %arg6: memref<1x2x2x256xf32, #tpu.memory_space<vmem>>) attributes {dimension_semantics = [#tpu.dimension_semantics<parallel>, #tpu.dimension_semantics<parallel>], iteration_bounds = array<i64: 2, 1>, scalar_prefetch = 0 : i64, scratch_operands = 0 : i64, tpu.core_type = #tpu.core_type<tc>, window_params = [{transform_indices = @transform_0, window_bounds = array<i64: 1, 2, 256>}, {transform_indices = @transform_1, window_bounds = array<i64: 1, 2, 256>}, {pipeline_mode = #tpu.pipeline_mode<synchronous>, transform_indices = @transform_2, window_bounds = array<i64: 1, 2, 2>}, {pipeline_mode = #tpu.pipeline_mode<synchronous>, transform_indices = @transform_3, window_bounds = array<i64: 1, 2, 2>}, {transform_indices = @transform_4, window_bounds = array<i64: 1, 2, 2, 256>}]} {
    %c0 = arith.constant 0 : index
    %c0_0 = arith.constant 0 : index
    %c0_1 = arith.constant 0 : index
    %0 = vector.load %arg2[%c0, %c0_0, %c0_1] : memref<1x2x256xf32, #tpu.memory_space<vmem>>, vector<1x2x256xf32>
    %c0_2 = arith.constant 0 : index
    %c0_3 = arith.constant 0 : index
    %c0_4 = arith.constant 0 : index
    %1 = vector.load %arg3[%c0_2, %c0_3, %c0_4] : memref<1x2x256xf32, #tpu.memory_space<vmem>>, vector<1x2x256xf32>
    %cst = arith.constant dense<0.000000e+00> : vector<1x256xf32>
    %2 = vector.multi_reduction <add>, %0, %cst [1] : vector<1x2x256xf32> to vector<1x256xf32>
    %3 = vector.shape_cast %2 : vector<1x256xf32> to vector<1x1x256xf32>
    %cst_5 = arith.constant dense<0.000000e+00> : vector<1x256xf32>
    %4 = vector.multi_reduction <add>, %1, %cst_5 [1] : vector<1x2x256xf32> to vector<1x256xf32>
    %5 = vector.shape_cast %4 : vector<1x256xf32> to vector<1x1x256xf32>
    %6 = arith.addf %3, %5 : vector<1x1x256xf32>
    %cst_6 = arith.constant 2.500000e-01 : f32
    %7 = vector.broadcast %cst_6 : f32 to vector<1x1x256xf32>
    %8 = arith.mulf %6, %7 : vector<1x1x256xf32>
    %9 = vector.broadcast %8 : vector<1x1x256xf32> to vector<1x2x256xf32>
    %10 = arith.subf %0, %9 : vector<1x2x256xf32>
    %11 = vector.broadcast %8 : vector<1x1x256xf32> to vector<1x2x256xf32>
    %12 = arith.subf %1, %11 : vector<1x2x256xf32>
    %13 = arith.mulf %10, %10 : vector<1x2x256xf32>
    %cst_7 = arith.constant dense<0.000000e+00> : vector<1x256xf32>
    %14 = vector.multi_reduction <add>, %13, %cst_7 [1] : vector<1x2x256xf32> to vector<1x256xf32>
    %15 = vector.shape_cast %14 : vector<1x256xf32> to vector<1x1x256xf32>
    %16 = arith.mulf %12, %12 : vector<1x2x256xf32>
    %cst_8 = arith.constant dense<0.000000e+00> : vector<1x256xf32>
    %17 = vector.multi_reduction <add>, %16, %cst_8 [1] : vector<1x2x256xf32> to vector<1x256xf32>
    %18 = vector.shape_cast %17 : vector<1x256xf32> to vector<1x1x256xf32>
    %19 = arith.addf %15, %18 : vector<1x1x256xf32>
    %cst_9 = arith.constant 2.500000e-01 : f32
    %20 = vector.broadcast %cst_9 : f32 to vector<1x1x256xf32>
    %21 = arith.mulf %19, %20 : vector<1x1x256xf32>
    %cst_10 = arith.constant 9.99999997E-7 : f32
    %22 = vector.broadcast %cst_10 : f32 to vector<1x1x256xf32>
    %23 = arith.addf %21, %22 : vector<1x1x256xf32>
    %24 = math.rsqrt %23 : vector<1x1x256xf32>
    %c0_11 = arith.constant 0 : index
    %c0_12 = arith.constant 0 : index
    %c0_13 = arith.constant 0 : index
    %25 = vector.load %arg4[%c0_11, %c0_12, %c0_13] : memref<1x2x2xf32, #tpu.memory_space<vmem>>, vector<1x2x2xf32>
    %c0_14 = arith.constant 0 : index
    %c0_15 = arith.constant 0 : index
    %c0_16 = arith.constant 0 : index
    %26 = vector.load %arg5[%c0_14, %c0_15, %c0_16] : memref<1x2x2xf32, #tpu.memory_space<vmem>>, vector<1x2x2xf32>
    %27 = vector.extract_strided_slice %25 {offsets = [0, 0, 0], sizes = [1, 2, 1], strides = [1, 1, 1]} : vector<1x2x2xf32> to vector<1x2x1xf32>
    %28 = vector.broadcast %24 : vector<1x1x256xf32> to vector<1x2x256xf32>
    %29 = arith.mulf %10, %28 : vector<1x2x256xf32>
    %30 = vector.broadcast %27 : vector<1x2x1xf32> to vector<1x2x256xf32>
    %31 = arith.mulf %30, %29 : vector<1x2x256xf32>
    %32 = vector.extract_strided_slice %26 {offsets = [0, 0, 0], sizes = [1, 2, 1], strides = [1, 1, 1]} : vector<1x2x2xf32> to vector<1x2x1xf32>
    %33 = vector.broadcast %32 : vector<1x2x1xf32> to vector<1x2x256xf32>
    %34 = arith.addf %31, %33 : vector<1x2x256xf32>
    %35 = vector.extract_strided_slice %25 {offsets = [0, 0, 1], sizes = [1, 2, 1], strides = [1, 1, 1]} : vector<1x2x2xf32> to vector<1x2x1xf32>
    %36 = vector.broadcast %24 : vector<1x1x256xf32> to vector<1x2x256xf32>
    %37 = arith.mulf %12, %36 : vector<1x2x256xf32>
    %38 = vector.broadcast %35 : vector<1x2x1xf32> to vector<1x2x256xf32>
    %39 = arith.mulf %38, %37 : vector<1x2x256xf32>
    %40 = vector.extract_strided_slice %26 {offsets = [0, 0, 1], sizes = [1, 2, 1], strides = [1, 1, 1]} : vector<1x2x2xf32> to vector<1x2x1xf32>
    %41 = vector.broadcast %40 : vector<1x2x1xf32> to vector<1x2x256xf32>
    %42 = arith.addf %39, %41 : vector<1x2x256xf32>
    %43 = vector.shape_cast %34 : vector<1x2x256xf32> to vector<1x2x1x256xf32>
    %c0_17 = arith.constant 0 : index
    %c0_18 = arith.constant 0 : index
    %c0_19 = arith.constant 0 : index
    %c0_20 = arith.constant 0 : index
    %44 = vector.load %arg6[%c0_17, %c0_18, %c0_19, %c0_20] : memref<1x2x2x256xf32, #tpu.memory_space<vmem>>, vector<1x2x1x256xf32>
    tpu.vector_store %arg6[%c0_17, %c0_18, %c0_19, %c0_20], %43 {strides = array<i32>} : memref<1x2x2x256xf32, #tpu.memory_space<vmem>>, vector<1x2x1x256xf32>,
    %45 = vector.shape_cast %42 : vector<1x2x256xf32> to vector<1x2x1x256xf32>
    %c0_21 = arith.constant 0 : index
    %c0_22 = arith.constant 0 : index
    %c1 = arith.constant 1 : index
    %c0_23 = arith.constant 0 : index
    %46 = vector.load %arg6[%c0_21, %c0_22, %c1, %c0_23] : memref<1x2x2x256xf32, #tpu.memory_space<vmem>>, vector<1x2x1x256xf32>
    tpu.vector_store %arg6[%c0_21, %c0_22, %c1, %c0_23], %45 {strides = array<i32>} : memref<1x2x2x256xf32, #tpu.memory_space<vmem>>, vector<1x2x1x256xf32>,
    return
  }
  func.func @transform_0(%arg0: i32, %arg1: i32) -> (i32, i32, i32) {
    %c0_i32 = arith.constant 0 : i32
    %c0_i32_0 = arith.constant 0 : i32
    return %arg0, %c0_i32, %arg1 : i32, i32, i32
  }
  func.func @transform_1(%arg0: i32, %arg1: i32) -> (i32, i32, i32) {
    %c0_i32 = arith.constant 0 : i32
    %c0_i32_0 = arith.constant 0 : i32
    return %arg0, %c0_i32, %arg1 : i32, i32, i32
  }
  func.func @transform_2(%arg0: i32, %arg1: i32) -> (i32, i32, i32) {
    %c0_i32 = arith.constant 0 : i32
    %c0_i32_0 = arith.constant 0 : i32
    %c0_i32_1 = arith.constant 0 : i32
    %c0_i32_2 = arith.constant 0 : i32
    return %c0_i32, %c0_i32_0, %c0_i32_1 : i32, i32, i32
  }
  func.func @transform_3(%arg0: i32, %arg1: i32) -> (i32, i32, i32) {
    %c0_i32 = arith.constant 0 : i32
    %c0_i32_0 = arith.constant 0 : i32
    %c0_i32_1 = arith.constant 0 : i32
    %c0_i32_2 = arith.constant 0 : i32
    return %c0_i32, %c0_i32_0, %c0_i32_1 : i32, i32, i32
  }
  func.func @transform_4(%arg0: i32, %arg1: i32) -> (i32, i32, i32, i32) {
    %c0_i32 = arith.constant 0 : i32
    %c0_i32_0 = arith.constant 0 : i32
    %c0_i32_1 = arith.constant 0 : i32
    return %arg0, %c0_i32, %c0_i32_0, %arg1 : i32, i32, i32, i32
  }
}

</mosaic_0001>

<bundles_post_ra>
// kernel: global_local_conv2_norm.4
= control target key start
LH: loop header
LB: loop body
LE: loop exit
PB: predicated region body
PF: predicated region fallthrough
CT: control target
= control target key end

     0   :  { %s748_s15 = smov 0   ;;  %s750_s16 = smov 0   ;;  %s996_s0 = inlined_call_operand.vmem [shape: f32[2,2,256], index: 0, kind: input, shape index: {}]   ;;  %s997_s1 = inlined_call_operand.vmem [shape: f32[1,2,9], index: 1, kind: input, shape index: {}]   ;;  %s998_s2 = inlined_call_operand.vmem [shape: s32[1,1,256], index: 2, kind: input, shape index: {}]   ;;  %s999_s3 = inlined_call_operand.vmem [shape: s32[1,1,256], index: 3, kind: input, shape index: {}]   ;;  %s1000_s4 = inlined_call_operand.vmem [shape: f32[2,2,256], index: 4, kind: output, shape index: {}]  }
   0x1   :  { %s752_s17 = smov 0  }
   0x2 LB: > { %s26_s18 = sadd.s32 1, %s699_s16  ;;  %p620_p0 = scmp.ge.s32.totalorder %s703_s17, 1  ;;  %s703_s17 = sphi %s752_s17, %s14_s17   ;;  %s699_s16 = sphi %s750_s16, %s1032_s16   ;;  %s695_s15 = sphi %s748_s15, %s1031_s15  }
   0x3   : > { %p28_p1 = scmp.ge.s32.totalorder %s26_s18, 2  ;;  %p191_p2 = scmp.lt.s32.totalorder %s703_s17, 3 }
   0x5   : > { %s1034_s18 = smov (%p28_p1, %s26_s18), 0  ;;  %p192_p3 = pnand %p620_p0, %p191_p2 }
   0x6   : > { %p229_p4 = scmp.lt.s32.totalorder (!%p192_p3), %s695_s15, 1  ;;  %s709_s25 = smov (!%p192_p3), 17  }
   0x7   : > { %195 = sbr.rel (%p192_p3) target bundleno = 298 (0x12a), region = 36  ;;  %s710_s26 = smov (!%p192_p3), 16  }
   0x8   : > { %s711_s27 = smov (!%p192_p3), 15   ;;  %s713_s28 = smov (!%p192_p3), 1  }
   0x9   : > { %s719_s29 = smov (!%p192_p3), 127   ;;  %s720_s30 = smov (!%p192_p3), 113  }
   0xa   : > { %s721_s5 = smov (!%p192_p3), 112   ;;  %s722_s6 = smov (!%p192_p3), 111  }
   0xc   : > { %v769_v0 = vld [vmem:[%s997_s1] sm:$0x3]  ;;  %v705_v1 = vmov 4   ;;  %v706_v2 = vmov 0   ;;  %s1036_s15 = smov (!%p229_p4, %s695_s15), 1  ;;  %v707_v4 = vmov 2   ;;  %v269_v48 = vlaneseq }
   0xd   : > { %671 = vset.pattern.permute.xlu0 %v705_v1  ;;  %672 = vset.pattern.permute.xlu1 %v706_v2  ;;  %s627_s21 = sshll.u32 %s1036_s15, 2  ;;  %v708_v5 = vmov 1   ;;  %v712_v12 = vmov 3   ;;  %v714_v15 = vmov 5   ;;  %v715_v16 = vmov 6  }
   0xe   : > { %374 = vperm.xlu0 %671, %v769_v0   ;;  %284 = vperm.xlu1 %672, %v769_v0   ;;  %s237_s24 = scalar_lea.vmem %s996_s0, %s627_s21  ;;  %v716_v17 = vmov 269488144   ;;  %v717_v22 = vmov 7   ;;  %v718_v26 = vmov 8   ;;  %v809_v43 = vld [vmem:[%s998_s2] sm:$0x3]  ;;  %s250_s13 = scalar_lea.vmem %s1000_s4, %s627_s21 }
   0xf   : > { %v782_v3 = vld [vmem:[%s237_s24] sm:$0xf]  ;;  %v377_v18 = vunpack.c.l.s4 %v716_v17  ;;  %vm255_vm0 = vcmp.ge.s32.totalorder %v809_v43, 1  ;;  %v825_v51 = vand.u32 127, %v269_v48  ;;  %vm256_vm13 = vcmp.le.s32.totalorder %v809_v43, 14 }
  0x10   : > { %260 = vst [vmem:[#allocation1] ss:$4 sm:$0xff] %v782_v3  ;;  %v814_v44 = vld [vmem:[%s999_s3] sm:$0x3]  ;;  %v303_v50 = vsel %vm255_vm0, 1, %v706_v2  ;;  %v457_v48 = vsel %vm256_vm13, 1, %v706_v2 }
  0x11   : > { %v378_v19 = vunpack.c.0.s8 %v377_v18  ;;  %vm257_vm1 = vcmp.ge.s32.totalorder %v814_v44, 1  ;;  %vm258_vm3 = vcmp.le.s32.totalorder %v814_v44, 14  ;;  %v304_v56 = vperm.slane %v303_v50, 0 }
  0x12   : > { %vm274_vm2 = vmand %vm255_vm0, %vm257_vm1  ;;  %v305_v57 = vperm.slane %v303_v50, 1  ;;  %vm271_vm5 = vcmp.lt.s32.totalorder %v825_v51, 17  ;;  %vm300_vm6 = vcmp.lt.s32.totalorder %v825_v51, 16  ;;  %vm327_vm11 = vcmp.lt.s32.totalorder %v825_v51, 15 }
  0x13   : > { %v275_v49 = vsel %vm274_vm2, 1, %v706_v2  ;;  %vm330_vm4 = vmand %vm255_vm0, %vm258_vm3  ;;  %vm844_vm9 = vcmp.eq.s32.totalorder %v304_v56, 1  ;;  %vm355_vm15 = vcmp.lt.s32.totalorder %v825_v51, 1 }
  0x14   : > { %v276_v54 = vperm.slane %v275_v49, 0  ;;  %v277_v55 = vperm.slane %v275_v49, 1  ;;  %v331_v58 = vsel %vm330_vm4, 1, %v706_v2  ;;  %vm848_vm10 = vcmp.eq.s32.totalorder %v305_v57, 1  ;;  %vm429_vm0 = vmand %vm256_vm13, %vm257_vm1 }
  0x15   : > { %v333_v63 = vperm.slane %v331_v58, 1 }
  0x16   : > { %674 = vset.pattern.permute.xlu1 %v707_v4  ;;  %673 = vset.pattern.permute.xlu0 %v708_v5  ;;  %vm836_vm7 = vcmp.eq.s32.totalorder %v276_v54, 1  ;;  %vm840_vm8 = vcmp.eq.s32.totalorder %v277_v55, 1  ;;  %v358_v4 = vsel %vm257_vm1, 1, %v706_v2  ;;  %vm399_vm1 = vcmp.lt.s32.totalorder %v825_v51, 127 }
  0x17   : > { %v262_v6 = vld.sshfl [vmem:[#allocation1 + $0x8] sm:$0xff pattern:$0x73625140]  ;;  %v261_v7 = vld.sshfl [vmem:[#allocation1] sm:$0xff pattern:$0x73625140] }
  0x18   : > { %267 = vrot.lane.b32.xlu1 %v262_v6, %s709_s25  ;;  %265 = vrot.lane.b32.xlu0 %v261_v7, %s709_s25  ;;  %291 = vst [vmem:[#allocation1] ss:$4 sm:$0xff] %v782_v3  ;;  %v332_v7 = vperm.slane %v331_v58, 0  ;;  %vm860_vm12 = vcmp.eq.s32.totalorder %v333_v63, 1  ;;  %v459_v58 = vperm.slane %v457_v48, 1 }
  0x1a   : > { %vm869_vm14 = vcmp.eq.s32.totalorder %v332_v7, 1 }
  0x1f   : > { %v292_v8 = vld.sshfl [vmem:[#allocation1] sm:$0xff pattern:$0x73625140]  ;;  %v293_v9 = vld.sshfl [vmem:[#allocation1 + $0x8] sm:$0xff pattern:$0x73625140] }
  0x20   : > { %318 = vst [vmem:[#allocation1] ss:$4 sm:$0xff] %v782_v3  ;;  %339 = vperm.xlu1 %674, %v769_v0   ;;  %311 = vperm.xlu0 %673, %v769_v0  }
  0x21   : > { %296 = vrot.lane.b32.xlu2 %v292_v8, %s710_s26 }
  0x27   : > { %v319_v10 = vld.sshfl [vmem:[#allocation1] sm:$0xff pattern:$0x73625140]  ;;  %v320_v11 = vld.sshfl [vmem:[#allocation1 + $0x8] sm:$0xff pattern:$0x73625140] }
  0x28   : > { %323 = vrot.lane.b32.xlu1 %v319_v10, %s711_s27  ;;  %346 = vst [vmem:[#allocation1] ss:$4 sm:$0xff] %v782_v3  ;;  %680 = vset.pattern.permute.xlu0 %v718_v26 }
  0x29   : > { %675 = vset.pattern.permute.xlu1 %v712_v12  ;;  %298 = vrot.lane.b32.xlu2 %v293_v9, %s710_s26  ;;  %v360_v12 = vperm.slane %v358_v4, 1 }
  0x2b   : > { %vm886_vm2 = vcmp.eq.s32.totalorder %v360_v12, 1 }
  0x2f   : > { %v348_v13 = vld.sshfl [vmem:[#allocation1 + $0x8] sm:$0xff pattern:$0x73625140]  ;;  %v347_v14 = vld.sshfl [vmem:[#allocation1] sm:$0xff pattern:$0x73625140] }
  0x30   : > { %353 = vrot.lane.b32.xlu0 %v348_v13, %s713_s28  ;;  %366 = vperm.xlu1 %675, %v769_v0  }
  0x31   : > { %325 = vrot.lane.b32.xlu2 %v320_v11, %s711_s27 }
  0x38   : > { %676 = vset.pattern.permute.xlu1 %v714_v15 }
  0x39   : > { %351 = vrot.lane.b32.xlu2 %v347_v14, %s713_s28  ;;  %410 = vperm.xlu1 %676, %v769_v0  }
  0x41   : > { %677 = vset.pattern.permute.xlu1 %v715_v16 }
  0x42   : > { %438 = vperm.xlu1 %677, %v769_v0  }
  0x4a   : > { %678 = vset.pattern.permute.xlu1 %v717_v22 }
  0x4b   : > { %465 = vperm.xlu1 %678, %v769_v0  }
  0x53   : > { %679 = vset.pattern.permute.xlu1 %v718_v26 }
  0x54   : > { %493 = vperm.xlu1 %679, %v769_v0  }
  0x7b   : > { %v297_v36 = vpop.permute.xlu2 %296 }
  0x80   : > { %v375_v20 = vpop.permute.xlu0 %374  ;;  %v285_v35 = vpop.permute.xlu1 %284 }
  0x81   : > { %v379_v21 = vperm.slane %v375_v20, %v378_v19  ;;  %v359_v19 = vperm.slane %v358_v4, 0 }
  0x83   : > { %v381_v23 = vmul.f32 %v379_v21, %v782_v3  ;;  %v299_v38 = vpop.permute.xlu2 %298  ;;  %vm893_vm4 = vcmp.eq.s32.totalorder %v359_v19, 1 }
  0x84   : > { %v301_v1 = vsel %vm300_vm6, %v297_v36, %v299_v38  ;;  %v302_v6 = vsel %vm300_vm6, %v299_v38, %v297_v36  ;;  %vm484_vm6 = vmand %vm256_vm13, %vm258_vm3  ;;  %vm481_vm13 = vcmp.lt.s32.totalorder %v825_v51, 111 }
  0x85   : > { %383 = vst [vmem:[#allocation1] ss:$4 sm:$0xff] %v381_v23  ;;  %v309_v10 = vsel %vm848_vm10, %v301_v1, 0.0  ;;  %v308_v14 = vsel %vm844_vm9, %v302_v6, 0.0 }
  0x8a   : > { %v268_v37 = vpop.permute.xlu1 %267  ;;  %v266_v40 = vpop.permute.xlu0 %265 }
  0x8b   : > { %v326_v41 = vpop.permute.xlu2 %325  ;;  %v272_v0 = vsel %vm271_vm5, %v266_v40, %v268_v37  ;;  %v273_v5 = vsel %vm271_vm5, %v268_v37, %v266_v40  ;;  %v430_v37 = vsel %vm429_vm0, 1, %v706_v2  ;;  %vm426_vm5 = vcmp.lt.s32.totalorder %v825_v51, 113 }
  0x8c   : > { %v795_v24 = vld.sshfl [vmem:[#allocation1] sm:$0xff pattern:$0x73625140]  ;;  %v797_v25 = vld.sshfl [vmem:[#allocation1 + $0x8] sm:$0xff pattern:$0x73625140] }
  0x8d   : > { %390 = vst [vmem:[#allocation1] ss:$4 sm:$0xff] %v782_v3  ;;  %v281_v9 = vsel %vm840_vm8, %v272_v0, 0.0  ;;  %v280_v13 = vsel %vm836_vm7, %v273_v5, 0.0  ;;  %v432_v49 = vperm.slane %v430_v37, 1  ;;  %v458_v0 = vperm.slane %v457_v48, 0 }
  0x8e   : > { %v288_v20 = vmul.f32 %v285_v35, %v281_v9  ;;  %v287_v23 = vmul.f32 %v285_v35, %v280_v13  ;;  %vm503_vm0 = vcmask 1041408  }
  0x8f   : > { %vm932_vm9 = vcmp.eq.s32.totalorder %v432_v49, 1 }
  0x92   : > { %v804_v39 = vpop.permute.xlu1 %339  ;;  %v312_v45 = vpop.permute.xlu0 %311 }
  0x93   : > { %v352_v46 = vpop.permute.xlu2 %351  ;;  %v315_v21 = vmul.f32 %v312_v45, %v309_v10  ;;  %v314_v26 = vmul.f32 %v312_v45, %v308_v14 }
  0x94   : > { %v392_v27 = vld.sshfl [vmem:[#allocation1 + $0x8] sm:$0xff pattern:$0x73625140]  ;;  %v391_v28 = vld.sshfl [vmem:[#allocation1] sm:$0xff pattern:$0x73625140] }
  0x95   : > { %397 = vrot.lane.b32.xlu0 %v392_v27, %s719_s29  ;;  %417 = vst [vmem:[#allocation1] ss:$4 sm:$0xff] %v782_v3  ;;  %395 = vrot.lane.b32.xlu2 %v391_v28, %s719_s29  ;;  %v316_v38 = vadd.f32 %v314_v26, %v287_v23 }
  0x9a   : > { %v324_v42 = vpop.permute.xlu1 %323 }
  0x9b   : > { %v328_v15 = vsel %vm327_vm11, %v324_v42, %v326_v41  ;;  %v329_v18 = vsel %vm327_vm11, %v326_v41, %v324_v42  ;;  %vm951_vm11 = vcmp.eq.s32.totalorder %v459_v58, 1 }
  0x9c   : > { %v419_v29 = vld.sshfl [vmem:[#allocation1 + $0x8] sm:$0xff pattern:$0x73625140]  ;;  %v418_v30 = vld.sshfl [vmem:[#allocation1] sm:$0xff pattern:$0x73625140] }
  0x9d   : > { %424 = vrot.lane.b32.xlu0 %v419_v29, %s720_s30  ;;  %445 = vst [vmem:[#allocation1] ss:$4 sm:$0xff] %v782_v3  ;;  %422 = vrot.lane.b32.xlu2 %v418_v30, %s720_s30  ;;  %v337_v27 = vsel %vm860_vm12, %v328_v15, 0.0  ;;  %v336_v28 = vsel %vm869_vm14, %v329_v18, 0.0  ;;  %vm960_vm12 = vcmp.eq.s32.totalorder %v458_v0, 1 }
  0x9e   : > { %v342_v40 = vmul.f32 %v804_v39, %v336_v28 }
  0xa0   : > { %v344_v55 = vadd.f32 %v342_v40, %v316_v38 }
  0xa2   : > { %v818_v47 = vpop.permute.xlu1 %366  ;;  %v354_v52 = vpop.permute.xlu0 %353 }
  0xa3   : > { %v356_v29 = vsel %vm355_vm15, %v352_v46, %v354_v52  ;;  %v357_v35 = vsel %vm355_vm15, %v354_v52, %v352_v46 }
  0xa4   : > { %v447_v31 = vld.sshfl [vmem:[#allocation1 + $0x8] sm:$0xff pattern:$0x73625140]  ;;  %v446_v32 = vld.sshfl [vmem:[#allocation1] sm:$0xff pattern:$0x73625140] }
  0xa5   : > { %452 = vrot.lane.b32.xlu0 %v447_v31, %s721_s5  ;;  %472 = vst [vmem:[#allocation1] ss:$4 sm:$0xff] %v782_v3  ;;  %450 = vrot.lane.b32.xlu2 %v446_v32, %s721_s5  ;;  %v402_v31 = vsel %vm258_vm3, 1, %v706_v2  ;;  %v364_v41 = vsel %vm886_vm2, %v356_v29, 0.0  ;;  %v363_v46 = vsel %vm893_vm4, %v357_v35, 0.0  ;;  %vm454_vm3 = vcmp.lt.s32.totalorder %v825_v51, 112 }
  0xa6   : > { %v404_v42 = vperm.slane %v402_v31, 1  ;;  %v403_v45 = vperm.slane %v402_v31, 0  ;;  %v370_v52 = vmul.f32 %v818_v47, %v364_v41  ;;  %v369_v60 = vmul.f32 %v818_v47, %v363_v46 }
  0xa7   : > { %v485_v47 = vsel %vm484_vm6, 1, %v706_v2 }
  0xa8   : > { %vm916_vm7 = vcmp.eq.s32.totalorder %v404_v42, 1  ;;  %vm924_vm8 = vcmp.eq.s32.totalorder %v403_v45, 1  ;;  %v486_v10 = vperm.slane %v485_v47, 0  ;;  %v487_v14 = vperm.slane %v485_v47, 1 }
  0xaa   : > { %vm975_vm14 = vcmp.eq.s32.totalorder %v486_v10, 1  ;;  %vm489_vm15 = vcmp.eq.s32.totalorder %v487_v14, 1 }
  0xab   : > { %v832_v59 = vpop.permute.xlu1 %410 }
  0xac   : > { %v474_v33 = vld.sshfl [vmem:[#allocation1 + $0x8] sm:$0xff pattern:$0x73625140]  ;;  %v473_v34 = vld.sshfl [vmem:[#allocation1] sm:$0xff pattern:$0x73625140] }
  0xad   : > { %479 = vrot.lane.b32.xlu0 %v474_v33, %s722_s6  ;;  %477 = vrot.lane.b32.xlu2 %v473_v34, %s722_s6  ;;  %v317_v33 = vadd.f32 %v315_v21, %v288_v20  ;;  %v343_v34 = vmul.f32 %v804_v39, %v337_v27  ;;  %v431_v39 = vperm.slane %v430_v37, 0 }
  0xaf   : > { %v345_v50 = vadd.f32 %v343_v34, %v317_v33  ;;  %vm941_vm10 = vcmp.eq.s32.totalorder %v431_v39, 1 }
  0xb1   : > { %v372_v1 = vadd.f32 %v370_v52, %v345_v50 }
  0xb3   : > { %v389_v18 = vadd.f32 %v797_v25, %v372_v1 }
  0xb4   : > { %v874_v22 = vpop.permute.xlu1 %438 }
  0xbd   : > { %v466_v44 = vpop.permute.xlu1 %465 }
  0xc6   : > { %v494_v30 = vpop.permute.xlu1 %493 }
  0xef   : > { %v829_v53 = vpop.permute.xlu2 %395 }
  0xf7   : > { %v423_v16 = vpop.permute.xlu2 %422 }
  0xff   : > { %v451_v54 = vpop.permute.xlu2 %450 }
 0x107   : > { %v398_v8 = vpop.permute.xlu0 %397  ;;  %v478_v23 = vpop.permute.xlu2 %477 }
 0x108   : > { %v401_v57 = vsel %vm399_vm1, %v398_v8, %v829_v53  ;;  %v400_v43 = vsel %vm399_vm1, %v829_v53, %v398_v8  ;;  %v371_v8 = vadd.f32 %v369_v60, %v344_v55 }
 0x109   : > { %v408_v3 = vsel %vm916_vm7, %v401_v57, 0.0  ;;  %v407_v5 = vsel %vm924_vm8, %v400_v43, 0.0 }
 0x10a   : > { %v414_v11 = vmul.f32 %v832_v59, %v408_v3  ;;  %v413_v15 = vmul.f32 %v832_v59, %v407_v5  ;;  %v388_v20 = vadd.f32 %v795_v24, %v371_v8 }
 0x10c   : > { %v416_v26 = vadd.f32 %v414_v11, %v389_v18  ;;  %v415_v25 = vadd.f32 %v413_v15, %v388_v20 }
 0x10f   : > { %v425_v36 = vpop.permute.xlu0 %424 }
 0x110   : > { %v428_v63 = vsel %vm426_vm5, %v425_v36, %v423_v16  ;;  %v427_v6 = vsel %vm426_vm5, %v423_v16, %v425_v36 }
 0x111   : > { %v436_v9 = vsel %vm932_vm9, %v428_v63, 0.0  ;;  %v435_v16 = vsel %vm941_vm10, %v427_v6, 0.0 }
 0x112   : > { %v442_v19 = vmul.f32 %v874_v22, %v436_v9  ;;  %v441_v27 = vmul.f32 %v874_v22, %v435_v16 }
 0x114   : > { %v444_v24 = vadd.f32 %v442_v19, %v416_v26  ;;  %v443_v35 = vadd.f32 %v441_v27, %v415_v25 }
 0x117   : > { %v453_v53 = vpop.permute.xlu0 %452 }
 0x118   : > { %v456_v7 = vsel %vm454_vm3, %v453_v53, %v451_v54  ;;  %v455_v12 = vsel %vm454_vm3, %v451_v54, %v453_v53 }
 0x119   : > { %v463_v17 = vsel %vm951_vm11, %v456_v7, 0.0  ;;  %v462_v21 = vsel %vm960_vm12, %v455_v12, 0.0 }
 0x11a   : > { %v469_v28 = vmul.f32 %v466_v44, %v463_v17  ;;  %v468_v31 = vmul.f32 %v466_v44, %v462_v21 }
 0x11c   : > { %v471_v36 = vadd.f32 %v469_v28, %v444_v24  ;;  %v470_v40 = vadd.f32 %v468_v31, %v443_v35 }
 0x11f   : > { %v480_v29 = vpop.permute.xlu0 %479 }
 0x120   : > { %v482_v32 = vsel %vm481_vm13, %v478_v23, %v480_v29  ;;  %v483_v33 = vsel %vm481_vm13, %v480_v29, %v478_v23 }
 0x121   : > { %v490_v51 = vsel %vm975_vm14, %v482_v32, 0.0  ;;  %v491_v34 = vsel %vm489_vm15, %v483_v33, 0.0 }
 0x122   : > { %v496_v37 = vmul.f32 %v494_v30, %v490_v51  ;;  %v497_v38 = vmul.f32 %v494_v30, %v491_v34 }
 0x124   : > { %v499_v22 = vadd.f32 %v497_v38, %v471_v36  ;;  %v498_v41 = vadd.f32 %v496_v37, %v470_v40 }
 0x126   : > { %v502_v42 = vrot.slane %v499_v22, 6 }
 0x128   : > { %v504_v45 = vsel %vm503_vm0, %v498_v41, %v502_v42 }
 0x129   : > { %506 = vst [vmem:[%s250_s13] sm:$0xf] %v504_v45 }
 0x12a PF: > { %s14_s17 = sadd.s32 1, %s703_s17   ;;  %s1031_s15 = smov %s699_s16 }
 0x12b   : > { %p11_p5 = scmp.ge.s32.totalorder %s14_s17, 4   ;;  %s1032_s16 = smov %s1034_s18 }
 0x12d   :  { %13 = sbr.rel (!%p11_p5) target bundleno = 2 (0x2), region = 69 }

// kernel: global_local_conv2_norm.3
= control target key start
LH: loop header
LB: loop body
LE: loop exit
PB: predicated region body
PF: predicated region fallthrough
CT: control target
= control target key end

     0   :  { %s621_s15 = smov 0   ;;  %s623_s16 = smov 0   ;;  %s673_s0 = inlined_call_operand.vmem [shape: f32[2,4,256], index: 0, kind: input, shape index: {}]   ;;  %s674_s1 = inlined_call_operand.vmem [shape: f32[1,4,1], index: 1, kind: input, shape index: {}]   ;;  %s675_s2 = inlined_call_operand.vmem [shape: f32[1,4,1], index: 2, kind: input, shape index: {}]   ;;  %s676_s3 = inlined_call_operand.vmem [shape: f32[2,2,256], index: 3, kind: output, shape index: {0}]   ;;  %s677_s4 = inlined_call_operand.vmem [shape: f32[2,2,256], index: 4, kind: output, shape index: {1}]  }
   0x1   :  { %s625_s17 = smov 0  }
   0x2 LB: > { %s27_s18 = sadd.s32 1, %s588_s16  ;;  %p525_p0 = scmp.ge.s32.totalorder %s592_s17, 1  ;;  %s592_s17 = sphi %s625_s17, %s15_s17   ;;  %s588_s16 = sphi %s623_s16, %s679_s16   ;;  %s584_s15 = sphi %s621_s15, %s678_s15  }
   0x3   : > { %p29_p1 = scmp.ge.s32.totalorder %s27_s18, 2  ;;  %p188_p2 = scmp.lt.s32.totalorder %s592_s17, 3 }
   0x5   : > { %s681_s18 = smov (%p29_p1, %s27_s18), 0  ;;  %p189_p3 = pnand %p525_p0, %p188_p2 }
   0x6   : > { %p232_p4 = scmp.lt.s32.totalorder (!%p189_p3), %s584_s15, 1 }
   0x7   : > { %192 = sbr.rel (%p189_p3) target bundleno = 149 (0x95), region = 32 }
   0xc   : > { %v343_v0 = vld [vmem:[%s674_s1] sm:$0xf]  ;;  %v594_v1 = vmov 0   ;;  %s683_s15 = smov (!%p232_p4, %s584_s15), 1  ;;  %v595_v2 = vmov 4.0   ;;  %vm268_vm0 = vcmask 1043456  }
   0xd   : > { %563 = vset.pattern.permute.xlu0 %v594_v1  ;;  %s534_s21 = sshll.u32 %s683_s15, 3  ;;  %564 = vrcp.f32 %v595_v2  ;;  %v344_v4 = vld [vmem:[%s675_s2] sm:$0xf]  ;;  %s535_s27 = sshll.u32 %s683_s15, 2  ;;  %vm374_vm8 = vcmask 1041408  }
   0xe   : > { %353 = vperm.xlu0 %563, %v343_v0   ;;  %s239_s24 = scalar_lea.vmem %s673_s0, %s534_s21  ;;  %s249_s30 = scalar_lea.vmem %s676_s3, %s535_s27 }
   0xf   : > { %v261_v3 = vld [vmem:[%s239_s24] sm:$0xff]  ;;  %s259_s7 = scalar_lea.vmem %s677_s4, %s535_s27 }
  0x10   : > { %263 = vst [vmem:[#allocation1] ss:$2 sm:$0xff] %v261_v3 }
  0x13   : > { %v565_v5 = vpop.eup %564 }
  0x14   : > { %v284_v6 = vmul.f32 4.0, %v565_v5  ;;  %vm288_vm1 = vweird.f32 %v565_v5 }
  0x16   : > { %366 = vperm.xlu0 %563, %v344_v4   ;;  %v285_v7 = vsub.f32 1.0, %v284_v6 }
  0x17   : > { %v264_v8 = vld.sshfl [vmem:[#allocation1] sm:$0xff pattern:$0x75316420]  ;;  %v265_v9 = vld.sshfl [vmem:[#allocation1 + $0x8] sm:$0xff pattern:$0x75316420] }
  0x18   : > { %v269_v10 = vsel %vm268_vm0, %v264_v8, 0.0  ;;  %v276_v11 = vsel %vm268_vm0, %v265_v9, 0.0  ;;  %v286_v14 = vmul.f32 %v565_v5, %v285_v7 }
  0x19   : > { %v270_v12 = vrot.slane %v269_v10, 4  ;;  %v277_v13 = vrot.slane %v276_v11, 4 }
  0x1a   : > { %v287_v19 = vadd.f32 %v565_v5, %v286_v14 }
  0x1b   : > { %v271_v15 = vadd.f32 %v270_v12, %v269_v10  ;;  %v278_v16 = vadd.f32 %v277_v13, %v276_v11 }
  0x1c   : > { %v289_v24 = vsel %vm288_vm1, %v565_v5, %v287_v19 }
  0x1d   : > { %v272_v17 = vrot.slane %v271_v15, 2  ;;  %v279_v18 = vrot.slane %v278_v16, 2 }
  0x1f   : > { %v273_v20 = vadd.f32 %v272_v17, %v271_v15  ;;  %v280_v21 = vadd.f32 %v279_v18, %v278_v16 }
  0x21   : > { %v274_v22 = vrot.slane %v273_v20, 1  ;;  %v281_v23 = vrot.slane %v280_v21, 1 }
  0x23   : > { %v275_v25 = vadd.f32 %v274_v22, %v273_v20  ;;  %v282_v26 = vadd.f32 %v281_v23, %v280_v21 }
  0x25   : > { %v290_v27 = vmul.f32 %v289_v24, %v275_v25  ;;  %v291_v28 = vmul.f32 %v289_v24, %v282_v26 }
  0x27   : > { %v294_v29 = vrot.slane %v291_v28, 4 }
  0x29   : > { %v295_v30 = vsel %vm268_vm0, %v290_v27, %v294_v29 }
  0x2a   : > { %v297_v31 = vsub.f32 %v261_v3, %v295_v30 }
  0x2c   : > { %v298_v32 = vmul.f32 %v297_v31, %v297_v31 }
  0x2e   : > { %300 = vst [vmem:[#allocation1] ss:$2 sm:$0xff] %v298_v32 }
  0x35   : > { %v301_v33 = vld.sshfl [vmem:[#allocation1] sm:$0xff pattern:$0x75316420]  ;;  %v302_v34 = vld.sshfl [vmem:[#allocation1 + $0x8] sm:$0xff pattern:$0x75316420] }
  0x36   : > { %v305_v35 = vsel %vm268_vm0, %v301_v33, 0.0  ;;  %v312_v36 = vsel %vm268_vm0, %v302_v34, 0.0 }
  0x37   : > { %v306_v37 = vrot.slane %v305_v35, 4  ;;  %v313_v38 = vrot.slane %v312_v36, 4 }
  0x39   : > { %v307_v39 = vadd.f32 %v306_v37, %v305_v35  ;;  %v314_v40 = vadd.f32 %v313_v38, %v312_v36 }
  0x3b   : > { %v308_v41 = vrot.slane %v307_v39, 2  ;;  %v315_v42 = vrot.slane %v314_v40, 2 }
  0x3d   : > { %v309_v43 = vadd.f32 %v308_v41, %v307_v39  ;;  %v316_v44 = vadd.f32 %v315_v42, %v314_v40 }
  0x3f   : > { %v310_v45 = vrot.slane %v309_v43, 1  ;;  %v317_v46 = vrot.slane %v316_v44, 1 }
  0x41   : > { %v311_v47 = vadd.f32 %v310_v45, %v309_v43  ;;  %v318_v48 = vadd.f32 %v317_v46, %v316_v44 }
  0x43   : > { %v319_v49 = vmul.f32 %v311_v47, %v289_v24  ;;  %v320_v50 = vmul.f32 %v318_v48, %v289_v24 }
  0x45   : > { %v321_v51 = vadd.f32 1e-06, %v319_v49  ;;  %v322_v52 = vadd.f32 1e-06, %v320_v50 }
  0x47   : > { %566 = vrsqrt.f32 %v321_v51  ;;  %vm339_vm2 = vweird.f32 %v322_v52  ;;  %vm329_vm4 = vweird.f32 %v321_v51 }
  0x48   : > { %568 = vrsqrt.f32 %v322_v52 }
  0x4d   : > { %v567_v53 = vpop.eup %566 }
  0x4e   : > { %v569_v54 = vpop.eup %568  ;;  %v324_v55 = vmul.f32 %v567_v53, %v321_v51  ;;  %vm330_vm5 = vweird.f32 %v567_v53 }
  0x4f   : > { %v334_v56 = vmul.f32 %v569_v54, %v322_v52  ;;  %vm340_vm3 = vweird.f32 %v569_v54  ;;  %vm331_vm7 = vmor %vm329_vm4, %vm330_vm5 }
  0x50   : > { %v325_v57 = vmul.f32 %v567_v53, %v324_v55  ;;  %vm341_vm6 = vmor %vm339_vm2, %vm340_vm3 }
  0x51   : > { %v335_v58 = vmul.f32 %v569_v54, %v334_v56 }
  0x52   : > { %v326_v59 = vmul.f32 0.5, %v325_v57 }
  0x53   : > { %v336_v60 = vmul.f32 0.5, %v335_v58 }
  0x54   : > { %v327_v61 = vsub.f32 1.5, %v326_v59 }
  0x55   : > { %v337_v62 = vsub.f32 1.5, %v336_v60 }
  0x56   : > { %v328_v63 = vmul.f32 %v567_v53, %v327_v61 }
  0x57   : > { %v338_v0 = vmul.f32 %v569_v54, %v337_v62 }
  0x58   : > { %v332_v1 = vsel %vm331_vm7, %v567_v53, %v328_v63 }
  0x59   : > { %v342_v2 = vsel %vm341_vm6, %v569_v54, %v338_v0 }
  0x5a   : > { %v347_v3 = vrot.slane %v342_v2, 4 }
  0x5c   : > { %v348_v4 = vsel %vm268_vm0, %v332_v1, %v347_v3 }
  0x5d   : > { %v350_v5 = vmul.f32 %v348_v4, %v297_v31 }
  0x5f   : > { %357 = vst [vmem:[#allocation1] ss:$2 sm:$0xff] %v350_v5 }
  0x66   : > { %v358_v7 = vld.sshfl [vmem:[#allocation1] sm:$0xff pattern:$0x75316420]  ;;  %v359_v8 = vld.sshfl [vmem:[#allocation1 + $0x8] sm:$0xff pattern:$0x75316420] }
  0x80   : > { %v354_v6 = vpop.permute.xlu0 %353 }
  0x81   : > { %v362_v9 = vmul.f32 %v358_v7, %v354_v6  ;;  %v363_v10 = vmul.f32 %v359_v8, %v354_v6 }
  0x88   : > { %v367_v11 = vpop.permute.xlu0 %366 }
  0x89   : > { %v369_v12 = vadd.f32 %v367_v11, %v362_v9  ;;  %v370_v13 = vadd.f32 %v367_v11, %v363_v10 }
  0x8b   : > { %v373_v14 = vrot.slane %v370_v13, 6  ;;  %378 = vst.sshfl [vmem:[#allocation1] sm:$0xff pattern:$0x73625140] %v369_v12 }
  0x8c   : > { %379 = vst.sshfl [vmem:[#allocation1 + $0x8] sm:$0xff pattern:$0x73625140] %v370_v13 }
  0x8d   : > { %v375_v15 = vsel %vm374_vm8, %v369_v12, %v373_v14 }
  0x8e   : > { %377 = vst [vmem:[%s249_s30] sm:$0xf] %v375_v15 }
  0x93   : > { %v381_v16 = vld [vmem:[#allocation1 + $0x1] ss:$4 sm:$0xff] }
  0x94   : > { %383 = vst [vmem:[%s259_s7] sm:$0xf] %v381_v16 }
  0x95 PF: > { %s15_s17 = sadd.s32 1, %s592_s17   ;;  %s678_s15 = smov %s588_s16 }
  0x96   : > { %p12_p5 = scmp.ge.s32.totalorder %s15_s17, 4   ;;  %s679_s16 = smov %s681_s18 }
  0x98   :  { %14 = sbr.rel (!%p12_p5) target bundleno = 2 (0x2), region = 75 }

// kernel: reverse.0
= control target key start
LH: loop header
LB: loop body
LE: loop exit
PB: predicated region body
PF: predicated region fallthrough
CT: control target
= control target key end

     0   :  { %v56_v3 = vlaneseq  ;;  %v49_v5 = vld [vmem:[#allocation0 + $0x7] ss:$-1 sm:$0xff]  ;;  %v63_v6 = vld [vmem:[#allocation0 + $0x17] ss:$-1 sm:$0xff]  ;;  %s199_s0 = inlined_call_operand.vmem [shape: f32[2,2,16,7], index: 0, kind: input, shape index: {}]   ;;  %s200_s1 = inlined_call_operand.vmem [shape: f32[2,2,16,7], index: 1, kind: output, shape index: {}]  }
   0x1   :  { %v37_v0 = vld [vmem:[%s199_s0] sm:$0xff]  ;;  %v39_v1 = vld [vmem:[%s199_s0 + $0x8] sm:$0xff]  ;;  %v41_v2 = vld [vmem:[%s199_s0 + $0x10] sm:$0xff]  ;;  %v50_v7 = vrot.slane %v49_v5, 1  ;;  %v64_v8 = vrot.slane %v63_v6, 1 }
   0x2   :  { %38 = vst [vmem:[#allocation0 + $0x8] sm:$0xff] %v37_v0  ;;  %v43_v4 = vld [vmem:[%s199_s0 + $0x18] sm:$0xff]  ;;  %v77_v9 = vld [vmem:[#allocation0 + $0x27] ss:$-1 sm:$0xff]  ;;  %v91_v11 = vld [vmem:[#allocation0 + $0x37] ss:$-1 sm:$0xff] }
   0x3   :  { %40 = vst [vmem:[#allocation0 + $0x18] sm:$0xff] %v39_v1  ;;  %v78_v10 = vrot.slane %v77_v9, 1  ;;  %v57_v12 = vshrl.u32 %v56_v3, 7  ;;  %v92_v13 = vrot.slane %v91_v11, 1 }
   0x4   :  { %42 = vst [vmem:[#allocation0 + $0x28] sm:$0xff] %v41_v2 }
   0x5   :  { %44 = vst [vmem:[#allocation0 + $0x38] sm:$0xff] %v43_v4  ;;  %vm58_vm0 = vcmp.lt.s32.totalorder %v57_v12, 7 }
   0x6   :  { %51 = vst [vmem:[#allocation1] sm:$0xff] %v50_v7 }
   0x7   :  { %65 = vst [vmem:[#allocation1 + $0x8] sm:$0xff] %v64_v8 }
   0x8   :  { %79 = vst [vmem:[#allocation1 + $0x10] sm:$0xff] %v78_v10 }
   0x9   :  { %v54_v14 = vld [vmem:[#allocation0 + $0xf] ss:$-1 sm:$0xff]  ;;  %93 = vst [vmem:[#allocation1 + $0x18] sm:$0xff] %v92_v13 }
   0xa   :  { %v55_v15 = vrot.slane %v54_v14, 1  ;;  %v68_v16 = vld [vmem:[#allocation0 + $0x1f] ss:$-1 sm:$0xff] }
   0xb   :  { %v69_v17 = vrot.slane %v68_v16, 1  ;;  %v82_v18 = vld [vmem:[#allocation0 + $0x2f] ss:$-1 sm:$0xff] }
   0xc   :  { %59 = vst.msk [vmem:[#allocation1] sm:$0xff] %vm58_vm0, %v55_v15  ;;  %v83_v19 = vrot.slane %v82_v18, 1  ;;  %v96_v20 = vld [vmem:[#allocation0 + $0x3f] ss:$-1 sm:$0xff] }
   0xd   :  { %73 = vst.msk [vmem:[#allocation1 + $0x8] sm:$0xff] %vm58_vm0, %v69_v17  ;;  %v97_v21 = vrot.slane %v96_v20, 1 }
   0xe   :  { %87 = vst.msk [vmem:[#allocation1 + $0x10] sm:$0xff] %vm58_vm0, %v83_v19 }
   0xf   :  { %101 = vst.msk [vmem:[#allocation1 + $0x18] sm:$0xff] %vm58_vm0, %v97_v21 }
  0x13   :  { %v136_v22 = vld [vmem:[#allocation1] sm:$0xff] }
  0x14   :  { %137 = vst [vmem:[%s200_s1] sm:$0xff] %v136_v22  ;;  %v138_v23 = vld [vmem:[#allocation1 + $0x8] sm:$0xff] }
  0x15   :  { %139 = vst [vmem:[%s200_s1 + $0x8] sm:$0xff] %v138_v23  ;;  %v140_v24 = vld [vmem:[#allocation1 + $0x10] sm:$0xff] }
  0x16   :  { %141 = vst [vmem:[%s200_s1 + $0x10] sm:$0xff] %v140_v24  ;;  %v142_v25 = vld [vmem:[#allocation1 + $0x18] sm:$0xff] }
  0x17   :  { %143 = vst [vmem:[%s200_s1 + $0x18] sm:$0xff] %v142_v25 }

// kernel: global_local_conv2_norm.5
= control target key start
LH: loop header
LB: loop body
LE: loop exit
PB: predicated region body
PF: predicated region fallthrough
CT: control target
= control target key end

     0   :  { %s680_s15 = smov 0   ;;  %s682_s16 = smov 0   ;;  %s762_s0 = inlined_call_operand.vmem [shape: f32[2,2,256], index: 0, kind: input, shape index: {}]   ;;  %s763_s1 = inlined_call_operand.vmem [shape: f32[2,2,256], index: 1, kind: input, shape index: {}]   ;;  %s764_s2 = inlined_call_operand.vmem [shape: f32[1,2,2], index: 2, kind: input, shape index: {}]   ;;  %s765_s3 = inlined_call_operand.vmem [shape: f32[1,2,2], index: 3, kind: input, shape index: {}]   ;;  %s766_s4 = inlined_call_operand.vmem [shape: f32[2,2,2,256], index: 4, kind: output, shape index: {}]  }
   0x1   :  { %s684_s17 = smov 0  }
   0x2 LB: > { %s26_s18 = sadd.s32 1, %s647_s16  ;;  %p580_p0 = scmp.ge.s32.totalorder %s651_s17, 1  ;;  %s651_s17 = sphi %s684_s17, %s14_s17   ;;  %s647_s16 = sphi %s682_s16, %s770_s16   ;;  %s643_s15 = sphi %s680_s15, %s769_s15  }
   0x3   : > { %p28_p1 = scmp.ge.s32.totalorder %s26_s18, 2  ;;  %p200_p2 = scmp.lt.s32.totalorder %s651_s17, 3 }
   0x5   : > { %s772_s18 = smov (%p28_p1, %s26_s18), 0  ;;  %p201_p3 = pnand %p580_p0, %p200_p2 }
   0x6   : > { %p244_p4 = scmp.lt.s32.totalorder (!%p201_p3), %s643_s15, 1 }
   0x7   : > { %204 = sbr.rel (%p201_p3) target bundleno = 148 (0x94), region = 36 }
   0xc   : > { %v395_v0 = vld [vmem:[%s764_s2] sm:$0x3]  ;;  %v653_v2 = vmov 0   ;;  %s774_s15 = smov (!%p244_p4, %s643_s15), 1  ;;  %v654_v4 = vmov 1   ;;  %vm281_vm0 = vcmask 1041408  }
   0xd   : > { %v396_v1 = vld [vmem:[%s765_s3] sm:$0x3]  ;;  %621 = vset.pattern.permute.xlu0 %v653_v2  ;;  %623 = vset.pattern.permute.xlu1 %v653_v2  ;;  %s592_s23 = sshll.u32 %s774_s15, 2  ;;  %s594_s30 = sshll.u32 %s774_s15, 3  ;;  %vm445_vm7 = vcmask 1040384   ;;  %vm447_vm8 = vcmask 1041409  }
   0xe   : > { %405 = vperm.xlu0 %621, %v395_v0   ;;  %418 = vperm.xlu1 %623, %v396_v1   ;;  %s251_s26 = scalar_lea.vmem %s762_s0, %s592_s23  ;;  %s261_s29 = scalar_lea.vmem %s763_s1, %s592_s23 }
   0xf   : > { %v273_v3 = vld [vmem:[%s251_s26] sm:$0xf]  ;;  %s271_s7 = scalar_lea.vmem %s766_s4, %s594_s30 }
  0x10   : > { %276 = vst [vmem:[#allocation1] ss:$4 sm:$0xff] %v273_v3  ;;  %v274_v5 = vld [vmem:[%s261_s29] sm:$0xf] }
  0x16   : > { %622 = vset.pattern.permute.xlu0 %v654_v4  ;;  %624 = vset.pattern.permute.xlu1 %v654_v4 }
  0x17   : > { %425 = vperm.xlu0 %622, %v395_v0   ;;  %437 = vperm.xlu1 %624, %v396_v1   ;;  %v277_v6 = vld.sshfl [vmem:[#allocation1] sm:$0xff pattern:$0x73625140]  ;;  %v278_v7 = vld.sshfl [vmem:[#allocation1 + $0x8] sm:$0xff pattern:$0x73625140] }
  0x18   : > { %v282_v8 = vsel %vm281_vm0, %v277_v6, 0.0  ;;  %v289_v9 = vsel %vm281_vm0, %v278_v7, 0.0  ;;  %297 = vst [vmem:[#allocation1] ss:$4 sm:$0xff] %v274_v5 }
  0x19   : > { %v283_v10 = vrot.slane %v282_v8, 4  ;;  %v290_v11 = vrot.slane %v289_v9, 4 }
  0x1b   : > { %v284_v12 = vadd.f32 %v283_v10, %v282_v8  ;;  %v291_v13 = vadd.f32 %v290_v11, %v289_v9 }
  0x1d   : > { %v285_v14 = vrot.slane %v284_v12, 2  ;;  %v292_v15 = vrot.slane %v291_v13, 2 }
  0x1f   : > { %v298_v16 = vld.sshfl [vmem:[#allocation1] sm:$0xff pattern:$0x73625140]  ;;  %v299_v17 = vld.sshfl [vmem:[#allocation1 + $0x8] sm:$0xff pattern:$0x73625140]  ;;  %v286_v20 = vadd.f32 %v285_v14, %v284_v12  ;;  %v293_v21 = vadd.f32 %v292_v15, %v291_v13 }
  0x20   : > { %v302_v18 = vsel %vm281_vm0, %v298_v16, 0.0  ;;  %v309_v19 = vsel %vm281_vm0, %v299_v17, 0.0 }
  0x21   : > { %v303_v22 = vrot.slane %v302_v18, 4  ;;  %v310_v23 = vrot.slane %v309_v19, 4  ;;  %v287_v26 = vrot.slane %v286_v20, 1  ;;  %v294_v27 = vrot.slane %v293_v21, 1 }
  0x23   : > { %v304_v24 = vadd.f32 %v303_v22, %v302_v18  ;;  %v311_v25 = vadd.f32 %v310_v23, %v309_v19  ;;  %v288_v32 = vadd.f32 %v287_v26, %v286_v20  ;;  %v295_v33 = vadd.f32 %v294_v27, %v293_v21 }
  0x25   : > { %v305_v28 = vrot.slane %v304_v24, 2  ;;  %v312_v29 = vrot.slane %v311_v25, 2 }
  0x27   : > { %v306_v30 = vadd.f32 %v305_v28, %v304_v24  ;;  %v313_v31 = vadd.f32 %v312_v29, %v311_v25 }
  0x29   : > { %v307_v34 = vrot.slane %v306_v30, 1  ;;  %v314_v35 = vrot.slane %v313_v31, 1 }
  0x2b   : > { %v308_v36 = vadd.f32 %v307_v34, %v306_v30  ;;  %v315_v37 = vadd.f32 %v314_v35, %v313_v31 }
  0x2d   : > { %v316_v38 = vadd.f32 %v308_v36, %v288_v32  ;;  %v317_v39 = vadd.f32 %v315_v37, %v295_v33 }
  0x2f   : > { %v318_v40 = vmul.f32 0.25, %v316_v38  ;;  %v319_v41 = vmul.f32 0.25, %v317_v39 }
  0x31   : > { %v322_v42 = vrot.slane %v319_v41, 6 }
  0x33   : > { %v323_v43 = vsel %vm281_vm0, %v318_v40, %v322_v42 }
  0x34   : > { %v718_v44 = vsub.f32 %v273_v3, %v323_v43  ;;  %v722_v46 = vsub.f32 %v274_v5, %v323_v43 }
  0x36   : > { %v327_v45 = vmul.f32 %v718_v44, %v718_v44  ;;  %v348_v47 = vmul.f32 %v722_v46, %v722_v46 }
  0x38   : > { %329 = vst [vmem:[#allocation1] ss:$4 sm:$0xff] %v327_v45 }
  0x3f   : > { %v330_v48 = vld.sshfl [vmem:[#allocation1] sm:$0xff pattern:$0x73625140]  ;;  %v331_v49 = vld.sshfl [vmem:[#allocation1 + $0x8] sm:$0xff pattern:$0x73625140] }
  0x40   : > { %v334_v50 = vsel %vm281_vm0, %v330_v48, 0.0  ;;  %v341_v51 = vsel %vm281_vm0, %v331_v49, 0.0  ;;  %350 = vst [vmem:[#allocation1] ss:$4 sm:$0xff] %v348_v47  ;;  %v452_v48 = vlaneseq }
  0x41   : > { %v335_v52 = vrot.slane %v334_v50, 4  ;;  %v342_v53 = vrot.slane %v341_v51, 4 }
  0x42   : > { %vm734_vm9 = vcmp.lt.s32.totalorder %v452_v48, 256 }
  0x43   : > { %v336_v54 = vadd.f32 %v335_v52, %v334_v50  ;;  %v343_v55 = vadd.f32 %v342_v53, %v341_v51 }
  0x45   : > { %v337_v56 = vrot.slane %v336_v54, 2  ;;  %v344_v57 = vrot.slane %v343_v55, 2 }
  0x47   : > { %v351_v58 = vld.sshfl [vmem:[#allocation1] sm:$0xff pattern:$0x73625140]  ;;  %v352_v59 = vld.sshfl [vmem:[#allocation1 + $0x8] sm:$0xff pattern:$0x73625140]  ;;  %v338_v62 = vadd.f32 %v337_v56, %v336_v54  ;;  %v345_v63 = vadd.f32 %v344_v57, %v343_v55 }
  0x48   : > { %v355_v60 = vsel %vm281_vm0, %v351_v58, 0.0  ;;  %v362_v61 = vsel %vm281_vm0, %v352_v59, 0.0 }
  0x49   : > { %v356_v0 = vrot.slane %v355_v60, 4  ;;  %v363_v1 = vrot.slane %v362_v61, 4  ;;  %v339_v4 = vrot.slane %v338_v62, 1  ;;  %v346_v5 = vrot.slane %v345_v63, 1 }
  0x4b   : > { %v357_v2 = vadd.f32 %v356_v0, %v355_v60  ;;  %v364_v3 = vadd.f32 %v363_v1, %v362_v61  ;;  %v340_v10 = vadd.f32 %v339_v4, %v338_v62  ;;  %v347_v11 = vadd.f32 %v346_v5, %v345_v63 }
  0x4d   : > { %v358_v6 = vrot.slane %v357_v2, 2  ;;  %v365_v7 = vrot.slane %v364_v3, 2 }
  0x4f   : > { %v359_v8 = vadd.f32 %v358_v6, %v357_v2  ;;  %v366_v9 = vadd.f32 %v365_v7, %v364_v3 }
  0x51   : > { %v360_v12 = vrot.slane %v359_v8, 1  ;;  %v367_v13 = vrot.slane %v366_v9, 1 }
  0x53   : > { %v361_v14 = vadd.f32 %v360_v12, %v359_v8  ;;  %v368_v15 = vadd.f32 %v367_v13, %v366_v9 }
  0x55   : > { %v369_v16 = vadd.f32 %v361_v14, %v340_v10  ;;  %v370_v17 = vadd.f32 %v368_v15, %v347_v11 }
  0x57   : > { %v371_v18 = vmul.f32 0.25, %v369_v16  ;;  %v372_v19 = vmul.f32 0.25, %v370_v17 }
  0x59   : > { %v373_v20 = vadd.f32 1e-06, %v371_v18  ;;  %v374_v21 = vadd.f32 1e-06, %v372_v19 }
  0x5b   : > { %625 = vrsqrt.f32 %v373_v20  ;;  %vm381_vm1 = vweird.f32 %v373_v20  ;;  %vm391_vm3 = vweird.f32 %v374_v21 }
  0x5c   : > { %627 = vrsqrt.f32 %v374_v21 }
  0x61   : > { %v626_v22 = vpop.eup %625 }
  0x62   : > { %v628_v23 = vpop.eup %627  ;;  %v376_v24 = vmul.f32 %v626_v22, %v373_v20  ;;  %vm382_vm2 = vweird.f32 %v626_v22 }
  0x63   : > { %v386_v25 = vmul.f32 %v628_v23, %v374_v21  ;;  %vm392_vm4 = vweird.f32 %v628_v23  ;;  %vm383_vm5 = vmor %vm381_vm1, %vm382_vm2 }
  0x64   : > { %v377_v26 = vmul.f32 %v626_v22, %v376_v24  ;;  %vm393_vm6 = vmor %vm391_vm3, %vm392_vm4 }
  0x65   : > { %v387_v27 = vmul.f32 %v628_v23, %v386_v25 }
  0x66   : > { %v378_v28 = vmul.f32 0.5, %v377_v26 }
  0x67   : > { %v388_v29 = vmul.f32 0.5, %v387_v27 }
  0x68   : > { %v379_v30 = vsub.f32 1.5, %v378_v28 }
  0x69   : > { %v389_v31 = vsub.f32 1.5, %v388_v29 }
  0x6a   : > { %v380_v32 = vmul.f32 %v626_v22, %v379_v30 }
  0x6b   : > { %v390_v33 = vmul.f32 %v628_v23, %v389_v31 }
  0x6c   : > { %v384_v34 = vsel %vm383_vm5, %v626_v22, %v380_v32 }
  0x6d   : > { %v394_v35 = vsel %vm393_vm6, %v628_v23, %v390_v33 }
  0x6e   : > { %v399_v36 = vrot.slane %v394_v35, 6 }
  0x70   : > { %v400_v37 = vsel %vm281_vm0, %v384_v34, %v399_v36 }
  0x71   : > { %v402_v38 = vmul.f32 %v400_v37, %v718_v44  ;;  %v423_v39 = vmul.f32 %v400_v37, %v722_v46 }
  0x73   : > { %409 = vst [vmem:[#allocation1] ss:$4 sm:$0xff] %v402_v38 }
  0x7a   : > { %v410_v40 = vld.sshfl [vmem:[#allocation1] sm:$0xff pattern:$0x73625140]  ;;  %v411_v41 = vld.sshfl [vmem:[#allocation1 + $0x8] sm:$0xff pattern:$0x73625140] }
  0x7b   : > { %429 = vst [vmem:[#allocation1] ss:$4 sm:$0xff] %v423_v39 }
  0x80   : > { %v406_v42 = vpop.permute.xlu0 %405  ;;  %v419_v43 = vpop.permute.xlu1 %418 }
  0x81   : > { %v414_v45 = vmul.f32 %v410_v40, %v406_v42  ;;  %v415_v47 = vmul.f32 %v411_v41, %v406_v42 }
  0x82   : > { %v430_v53 = vld.sshfl [vmem:[#allocation1] sm:$0xff pattern:$0x73625140]  ;;  %v431_v54 = vld.sshfl [vmem:[#allocation1 + $0x8] sm:$0xff pattern:$0x73625140] }
  0x83   : > { %v422_v49 = vadd.f32 %v419_v43, %v415_v47  ;;  %v421_v44 = vadd.f32 %v419_v43, %v414_v45 }
  0x85   : > { %v444_v46 = vrot.slane %v422_v49, 7 }
  0x87   : > { %v446_v51 = vsel %vm445_vm7, %v421_v44, %v444_v46  ;;  %v448_v52 = vsel %vm447_vm8, %v421_v44, %v444_v46 }
  0x88   : > { %v449_v55 = vrot.slane %v448_v52, 1  ;;  %456 = vst.msk [vmem:[%s271_s7] ss:$2 sm:$0x3] %vm734_vm9, %v446_v51 }
  0x89   : > { %v426_v56 = vpop.permute.xlu0 %425  ;;  %v438_v57 = vpop.permute.xlu1 %437 }
  0x8a   : > { %587 = vst.msk [vmem:[%s271_s7 + $0x4] ss:$2 sm:$0x3] %vm734_vm9, %v449_v55  ;;  %v434_v58 = vmul.f32 %v430_v53, %v426_v56  ;;  %v435_v59 = vmul.f32 %v431_v54, %v426_v56 }
  0x8c   : > { %v441_v60 = vadd.f32 %v438_v57, %v435_v59  ;;  %v440_v61 = vadd.f32 %v438_v57, %v434_v58 }
  0x8e   : > { %v461_v62 = vrot.slane %v441_v60, 7 }
  0x90   : > { %v462_v63 = vsel %vm445_vm7, %v440_v61, %v461_v62  ;;  %v463_v0 = vsel %vm447_vm8, %v440_v61, %v461_v62 }
  0x91   : > { %v464_v1 = vrot.slane %v463_v0, 1  ;;  %588 = vst.msk [vmem:[%s271_s7 + $0x1] ss:$2 sm:$0x3] %vm734_vm9, %v462_v63 }
  0x93   : > { %589 = vst.msk [vmem:[%s271_s7 + $0x5] ss:$2 sm:$0x3] %vm734_vm9, %v464_v1 }
  0x94 PF: > { %s14_s17 = sadd.s32 1, %s651_s17   ;;  %s769_s15 = smov %s647_s16 }
  0x95   : > { %p11_p5 = scmp.ge.s32.totalorder %s14_s17, 4   ;;  %s770_s16 = smov %s772_s18 }
  0x97   :  { %13 = sbr.rel (!%p11_p5) target bundleno = 2 (0x2), region = 72 }

</bundles_post_ra>
